<compile_context>
chip_gen: v5e
topology: v5e:2x2
jax: 0.10.0
libtpu: 0.0.40
codegen_flags: <defaults>
</compile_context>

<pallas_src>
import jax
import jax.numpy as jnp
from jax.experimental import pallas as pl
from jax.experimental.pallas import tpu as pltpu

COUT_PAD = 128   # conv output channels padded to a full lane width
NC_PAD = 128     # classifier logits padded to a full lane width


def _backbone_kernel(x_ref, wconv_ref, bconv_ref, wfc_ref, bfc_ref, out_ref):
    # x_ref:     [1, H+2, W+2, Cin]  one batch element, spatially padded NHWC
    # wconv_ref: [9*Cin, 128]        3x3 conv weights (im2col layout), Cout zero-padded
    # bconv_ref: [1, 128]            conv bias, zero-padded
    # wfc_ref:   [128, 128]          head weights with 1/HW pooling scale folded in
    # bfc_ref:   [1, 128]            head bias, zero-padded
    # out_ref:   [1, 1, 128]         lane-dense padded logits for this batch element
    _, hp, wp, cin = x_ref.shape
    h, w = hp - 2, wp - 2
    hw = h * w

    # Conv 3x3 / stride 1 / pad 1 as 9 accumulated MXU matmuls over shifted
    # windows read straight from the VMEM image tile (in-kernel im2col).
    # Conv bias is folded into the accumulator initialization.
    acc = jnp.broadcast_to(bconv_ref[...], (hw, COUT_PAD))
    k = 0
    for dh in range(3):
        for dw in range(3):
            patch = x_ref[0, dh:dh + h, dw:dw + w, :].reshape(hw, cin)   # [HW, Cin]
            w_k = wconv_ref[k * cin:(k + 1) * cin, :]                    # [Cin, 128]
            acc = acc + jnp.dot(patch, w_k, preferred_element_type=jnp.float32)
            k += 1
    feat = jnp.maximum(acc, 0.0)                                         # [HW, 128]

    # Global average pool as a skinny MXU matmul; the 1/HW scale is already
    # folded into wfc, so a plain sum is enough here.
    ones_row = jnp.ones((1, hw), jnp.float32)
    pooled = jnp.dot(ones_row, feat, preferred_element_type=jnp.float32)  # [1, 128]

    # Classifier head (lane-dense, padded classes).
    logits = jnp.dot(pooled, wfc_ref[...],
                     preferred_element_type=jnp.float32) + bfc_ref[...]   # [1, 128]
    out_ref[...] = logits.reshape(out_ref.shape).astype(out_ref.dtype)


def baseline_forward(x_nchw, params):
    """Full forward pass; all hot-path compute runs inside one Pallas kernel."""
    wconv, bconv, wfc, bfc = params
    B, Cin, H, W = x_nchw.shape
    cout = wconv.shape[1]
    num_classes = wfc.shape[1]
    HW = H * W
    Hp, Wp = H + 2, W + 2

    # NCHW -> NHWC and spatial zero-pad for the 3x3 / stride-1 / pad-1 conv.
    x_nhwc = jnp.transpose(x_nchw, (0, 2, 3, 1))
    x_pad = jnp.pad(x_nhwc, ((0, 0), (1, 1), (1, 1), (0, 0)))            # [B, H+2, W+2, Cin]

    # Lane-dense parameter padding (zeros keep the unpadded logits unchanged);
    # fold the 1/HW global-average-pool scale into the head weights.
    wconv_p = jnp.zeros((9 * Cin, COUT_PAD), jnp.float32).at[:, :cout].set(wconv)
    bconv_p = jnp.zeros((1, COUT_PAD), jnp.float32).at[0, :cout].set(bconv)
    wfc_p = jnp.zeros((COUT_PAD, NC_PAD), jnp.float32).at[:cout, :num_classes].set(wfc / HW)
    bfc_p = jnp.zeros((1, NC_PAD), jnp.float32).at[0, :num_classes].set(bfc)

    out_padded = pl.pallas_call(
        _backbone_kernel,
        out_shape=jax.ShapeDtypeStruct((B, 1, NC_PAD), jnp.float32),
        grid_spec=pltpu.PrefetchScalarGridSpec(
            num_scalar_prefetch=0,
            grid=(B,),
            in_specs=[
                pl.BlockSpec((1, Hp, Wp, Cin), lambda b: (b, 0, 0, 0)),   # image tile
                pl.BlockSpec((9 * Cin, COUT_PAD), lambda b: (0, 0)),      # conv weights
                pl.BlockSpec((1, COUT_PAD), lambda b: (0, 0)),            # conv bias
                pl.BlockSpec((COUT_PAD, NC_PAD), lambda b: (0, 0)),       # head weights
                pl.BlockSpec((1, NC_PAD), lambda b: (0, 0)),              # head bias
            ],
            out_specs=pl.BlockSpec((1, 1, NC_PAD), lambda b: (b, 0, 0)),
        ),
        compiler_params=pltpu.CompilerParams(
            dimension_semantics=("parallel",)),
    )(x_pad, wconv_p, bconv_p, wfc_p, bfc_p)

    return out_padded[:, 0, :num_classes]                                 # [B, num_classes]


def make_params(key, cin=4, cout=32, num_classes=5):
    k1, k2, k3, k4 = jax.random.split(key, 4)
    wconv = 0.1 * jax.random.normal(k1, (9 * cin, cout), jnp.float32)     # 3x3 conv, im2col layout
    bconv = 0.1 * jax.random.normal(k2, (cout,), jnp.float32)
    wfc = 0.1 * jax.random.normal(k3, (cout, num_classes), jnp.float32)
    bfc = 0.1 * jax.random.normal(k4, (num_classes,), jnp.float32)
    return wconv, bconv, wfc, bfc


def _reference(x_nchw, params):
    """Pure-JAX reference for sanity checking."""
    wconv, bconv, wfc, bfc = params
    x_nhwc = jnp.transpose(x_nchw, (0, 2, 3, 1))
    B, H, W, C = x_nhwc.shape
    xp = jnp.pad(x_nhwc, ((0, 0), (1, 1), (1, 1), (0, 0)))
    cols = [xp[:, dh:dh + H, dw:dw + W, :] for dh in range(3) for dw in range(3)]
    patches = jnp.concatenate(cols, axis=-1).reshape(B, H * W, 9 * C)
    feat = jnp.maximum(
        jnp.einsum("bnp,pc->bnc", patches, wconv,
                   precision=jax.lax.Precision.HIGHEST) + bconv, 0.0)
    pooled = jnp.mean(feat, axis=1)
    return jnp.dot(pooled, wfc, precision=jax.lax.Precision.HIGHEST) + bfc


if __name__ == "__main__":
    key = jax.random.PRNGKey(0)
    kx, kp = jax.random.split(key)

    B, Cin, H, W = 2, 4, 16, 16
    x = jax.random.normal(kx, (B, Cin, H, W), jnp.float32)
    params = make_params(kp, cin=Cin, cout=32, num_classes=5)

    out = jax.block_until_ready(baseline_forward(x, params))
    ref = _reference(x, params)

    assert out.shape == (B, 5), out.shape
    assert jnp.allclose(out, ref, atol=1e-4, rtol=1e-4), "mismatch vs reference"

    print("KERNEL_OK")
</pallas_src>

<mosaic_0001>
module attributes {stable_mosaic.version = 11 : i64} {
  func.func @_backbone_kernel(%arg0: i32, %arg1: memref<1x18x18x4xf32, #tpu.memory_space<vmem>>, %arg2: memref<36x128xf32, #tpu.memory_space<vmem>>, %arg3: memref<1x128xf32, #tpu.memory_space<vmem>>, %arg4: memref<128x128xf32, #tpu.memory_space<vmem>>, %arg5: memref<1x128xf32, #tpu.memory_space<vmem>>, %arg6: memref<1x1x128xf32, #tpu.memory_space<vmem>>) attributes {dimension_semantics = [#tpu.dimension_semantics<parallel>], iteration_bounds = array<i64: 2>, scalar_prefetch = 0 : i64, scratch_operands = 0 : i64, tpu.core_type = #tpu.core_type<tc>, window_params = [{transform_indices = @transform_0, window_bounds = array<i64: 1, 18, 18, 4>}, {pipeline_mode = #tpu.pipeline_mode<synchronous>, transform_indices = @transform_1, window_bounds = array<i64: 36, 128>}, {pipeline_mode = #tpu.pipeline_mode<synchronous>, transform_indices = @transform_2, window_bounds = array<i64: 1, 128>}, {pipeline_mode = #tpu.pipeline_mode<synchronous>, transform_indices = @transform_3, window_bounds = array<i64: 128, 128>}, {pipeline_mode = #tpu.pipeline_mode<synchronous>, transform_indices = @transform_4, window_bounds = array<i64: 1, 128>}, {transform_indices = @transform_5, window_bounds = array<i64: 1, 1, 128>}]} {
    %c0 = arith.constant 0 : index
    %c0_0 = arith.constant 0 : index
    %0 = vector.load %arg3[%c0, %c0_0] : memref<1x128xf32, #tpu.memory_space<vmem>>, vector<1x128xf32>
    %1 = vector.shape_cast %0 : vector<1x128xf32> to vector<1x128xf32>
    %2 = vector.broadcast %1 : vector<1x128xf32> to vector<256x128xf32>
    %c0_1 = arith.constant 0 : index
    %c0_2 = arith.constant 0 : index
    %c0_3 = arith.constant 0 : index
    %c0_4 = arith.constant 0 : index
    %3 = vector.load %arg1[%c0_1, %c0_2, %c0_3, %c0_4] : memref<1x18x18x4xf32, #tpu.memory_space<vmem>>, vector<1x16x16x4xf32>
    %4 = vector.shape_cast %3 : vector<1x16x16x4xf32> to vector<16x16x4xf32>
    %5 = vector.shape_cast %4 : vector<16x16x4xf32> to vector<256x4xf32>
    %c0_5 = arith.constant 0 : index
    %c0_6 = arith.constant 0 : index
    %6 = vector.load %arg2[%c0_5, %c0_6] : memref<36x128xf32, #tpu.memory_space<vmem>>, vector<4x128xf32>
    %cst = arith.constant dense<0.000000e+00> : vector<256x128xf32>
    %7 = tpu.matmul %5, %6, %cst {dimension_numbers = #tpu.dot_dimension_numbers<[1], [0], [0], [1], [0, 0, 1, 1], [], []>} : vector<256x4xf32>, vector<4x128xf32>, vector<256x128xf32> -> vector<256x128xf32>
    %8 = arith.addf %2, %7 : vector<256x128xf32>
    %c0_7 = arith.constant 0 : index
    %c0_8 = arith.constant 0 : index
    %c1 = arith.constant 1 : index
    %c0_9 = arith.constant 0 : index
    %9 = vector.load %arg1[%c0_7, %c0_8, %c1, %c0_9] : memref<1x18x18x4xf32, #tpu.memory_space<vmem>>, vector<1x16x16x4xf32>
    %10 = vector.shape_cast %9 : vector<1x16x16x4xf32> to vector<16x16x4xf32>
    %11 = vector.shape_cast %10 : vector<16x16x4xf32> to vector<256x4xf32>
    %c4 = arith.constant 4 : index
    %c0_10 = arith.constant 0 : index
    %12 = vector.load %arg2[%c4, %c0_10] : memref<36x128xf32, #tpu.memory_space<vmem>>, vector<4x128xf32>
    %cst_11 = arith.constant dense<0.000000e+00> : vector<256x128xf32>
    %13 = tpu.matmul %11, %12, %cst_11 {dimension_numbers = #tpu.dot_dimension_numbers<[1], [0], [0], [1], [0, 0, 1, 1], [], []>} : vector<256x4xf32>, vector<4x128xf32>, vector<256x128xf32> -> vector<256x128xf32>
    %14 = arith.addf %8, %13 : vector<256x128xf32>
    %c0_12 = arith.constant 0 : index
    %c0_13 = arith.constant 0 : index
    %c2 = arith.constant 2 : index
    %c0_14 = arith.constant 0 : index
    %15 = vector.load %arg1[%c0_12, %c0_13, %c2, %c0_14] : memref<1x18x18x4xf32, #tpu.memory_space<vmem>>, vector<1x16x16x4xf32>
    %16 = vector.shape_cast %15 : vector<1x16x16x4xf32> to vector<16x16x4xf32>
    %17 = vector.shape_cast %16 : vector<16x16x4xf32> to vector<256x4xf32>
    %c8 = arith.constant 8 : index
    %c0_15 = arith.constant 0 : index
    %18 = vector.load %arg2[%c8, %c0_15] : memref<36x128xf32, #tpu.memory_space<vmem>>, vector<4x128xf32>
    %cst_16 = arith.constant dense<0.000000e+00> : vector<256x128xf32>
    %19 = tpu.matmul %17, %18, %cst_16 {dimension_numbers = #tpu.dot_dimension_numbers<[1], [0], [0], [1], [0, 0, 1, 1], [], []>} : vector<256x4xf32>, vector<4x128xf32>, vector<256x128xf32> -> vector<256x128xf32>
    %20 = arith.addf %14, %19 : vector<256x128xf32>
    %c0_17 = arith.constant 0 : index
    %c1_18 = arith.constant 1 : index
    %c0_19 = arith.constant 0 : index
    %c0_20 = arith.constant 0 : index
    %21 = vector.load %arg1[%c0_17, %c1_18, %c0_19, %c0_20] : memref<1x18x18x4xf32, #tpu.memory_space<vmem>>, vector<1x16x16x4xf32>
    %22 = vector.shape_cast %21 : vector<1x16x16x4xf32> to vector<16x16x4xf32>
    %23 = vector.shape_cast %22 : vector<16x16x4xf32> to vector<256x4xf32>
    %c12 = arith.constant 12 : index
    %c0_21 = arith.constant 0 : index
    %24 = vector.load %arg2[%c12, %c0_21] : memref<36x128xf32, #tpu.memory_space<vmem>>, vector<4x128xf32>
    %cst_22 = arith.constant dense<0.000000e+00> : vector<256x128xf32>
    %25 = tpu.matmul %23, %24, %cst_22 {dimension_numbers = #tpu.dot_dimension_numbers<[1], [0], [0], [1], [0, 0, 1, 1], [], []>} : vector<256x4xf32>, vector<4x128xf32>, vector<256x128xf32> -> vector<256x128xf32>
    %26 = arith.addf %20, %25 : vector<256x128xf32>
    %c0_23 = arith.constant 0 : index
    %c1_24 = arith.constant 1 : index
    %c1_25 = arith.constant 1 : index
    %c0_26 = arith.constant 0 : index
    %27 = vector.load %arg1[%c0_23, %c1_24, %c1_25, %c0_26] : memref<1x18x18x4xf32, #tpu.memory_space<vmem>>, vector<1x16x16x4xf32>
    %28 = vector.shape_cast %27 : vector<1x16x16x4xf32> to vector<16x16x4xf32>
    %29 = vector.shape_cast %28 : vector<16x16x4xf32> to vector<256x4xf32>
    %c16 = arith.constant 16 : index
    %c0_27 = arith.constant 0 : index
    %30 = vector.load %arg2[%c16, %c0_27] : memref<36x128xf32, #tpu.memory_space<vmem>>, vector<4x128xf32>
    %cst_28 = arith.constant dense<0.000000e+00> : vector<256x128xf32>
    %31 = tpu.matmul %29, %30, %cst_28 {dimension_numbers = #tpu.dot_dimension_numbers<[1], [0], [0], [1], [0, 0, 1, 1], [], []>} : vector<256x4xf32>, vector<4x128xf32>, vector<256x128xf32> -> vector<256x128xf32>
    %32 = arith.addf %26, %31 : vector<256x128xf32>
    %c0_29 = arith.constant 0 : index
    %c1_30 = arith.constant 1 : index
    %c2_31 = arith.constant 2 : index
    %c0_32 = arith.constant 0 : index
    %33 = vector.load %arg1[%c0_29, %c1_30, %c2_31, %c0_32] : memref<1x18x18x4xf32, #tpu.memory_space<vmem>>, vector<1x16x16x4xf32>
    %34 = vector.shape_cast %33 : vector<1x16x16x4xf32> to vector<16x16x4xf32>
    %35 = vector.shape_cast %34 : vector<16x16x4xf32> to vector<256x4xf32>
    %c20 = arith.constant 20 : index
    %c0_33 = arith.constant 0 : index
    %36 = vector.load %arg2[%c20, %c0_33] : memref<36x128xf32, #tpu.memory_space<vmem>>, vector<4x128xf32>
    %cst_34 = arith.constant dense<0.000000e+00> : vector<256x128xf32>
    %37 = tpu.matmul %35, %36, %cst_34 {dimension_numbers = #tpu.dot_dimension_numbers<[1], [0], [0], [1], [0, 0, 1, 1], [], []>} : vector<256x4xf32>, vector<4x128xf32>, vector<256x128xf32> -> vector<256x128xf32>
    %38 = arith.addf %32, %37 : vector<256x128xf32>
    %c0_35 = arith.constant 0 : index
    %c2_36 = arith.constant 2 : index
    %c0_37 = arith.constant 0 : index
    %c0_38 = arith.constant 0 : index
    %39 = vector.load %arg1[%c0_35, %c2_36, %c0_37, %c0_38] : memref<1x18x18x4xf32, #tpu.memory_space<vmem>>, vector<1x16x16x4xf32>
    %40 = vector.shape_cast %39 : vector<1x16x16x4xf32> to vector<16x16x4xf32>
    %41 = vector.shape_cast %40 : vector<16x16x4xf32> to vector<256x4xf32>
    %c24 = arith.constant 24 : index
    %c0_39 = arith.constant 0 : index
    %42 = vector.load %arg2[%c24, %c0_39] : memref<36x128xf32, #tpu.memory_space<vmem>>, vector<4x128xf32>
    %cst_40 = arith.constant dense<0.000000e+00> : vector<256x128xf32>
    %43 = tpu.matmul %41, %42, %cst_40 {dimension_numbers = #tpu.dot_dimension_numbers<[1], [0], [0], [1], [0, 0, 1, 1], [], []>} : vector<256x4xf32>, vector<4x128xf32>, vector<256x128xf32> -> vector<256x128xf32>
    %44 = arith.addf %38, %43 : vector<256x128xf32>
    %c0_41 = arith.constant 0 : index
    %c2_42 = arith.constant 2 : index
    %c1_43 = arith.constant 1 : index
    %c0_44 = arith.constant 0 : index
    %45 = vector.load %arg1[%c0_41, %c2_42, %c1_43, %c0_44] : memref<1x18x18x4xf32, #tpu.memory_space<vmem>>, vector<1x16x16x4xf32>
    %46 = vector.shape_cast %45 : vector<1x16x16x4xf32> to vector<16x16x4xf32>
    %47 = vector.shape_cast %46 : vector<16x16x4xf32> to vector<256x4xf32>
    %c28 = arith.constant 28 : index
    %c0_45 = arith.constant 0 : index
    %48 = vector.load %arg2[%c28, %c0_45] : memref<36x128xf32, #tpu.memory_space<vmem>>, vector<4x128xf32>
    %cst_46 = arith.constant dense<0.000000e+00> : vector<256x128xf32>
    %49 = tpu.matmul %47, %48, %cst_46 {dimension_numbers = #tpu.dot_dimension_numbers<[1], [0], [0], [1], [0, 0, 1, 1], [], []>} : vector<256x4xf32>, vector<4x128xf32>, vector<256x128xf32> -> vector<256x128xf32>
    %50 = arith.addf %44, %49 : vector<256x128xf32>
    %c0_47 = arith.constant 0 : index
    %c2_48 = arith.constant 2 : index
    %c2_49 = arith.constant 2 : index
    %c0_50 = arith.constant 0 : index
    %51 = vector.load %arg1[%c0_47, %c2_48, %c2_49, %c0_50] : memref<1x18x18x4xf32, #tpu.memory_space<vmem>>, vector<1x16x16x4xf32>
    %52 = vector.shape_cast %51 : vector<1x16x16x4xf32> to vector<16x16x4xf32>
    %53 = vector.shape_cast %52 : vector<16x16x4xf32> to vector<256x4xf32>
    %c32 = arith.constant 32 : index
    %c0_51 = arith.constant 0 : index
    %54 = vector.load %arg2[%c32, %c0_51] : memref<36x128xf32, #tpu.memory_space<vmem>>, vector<4x128xf32>
    %cst_52 = arith.constant dense<0.000000e+00> : vector<256x128xf32>
    %55 = tpu.matmul %53, %54, %cst_52 {dimension_numbers = #tpu.dot_dimension_numbers<[1], [0], [0], [1], [0, 0, 1, 1], [], []>} : vector<256x4xf32>, vector<4x128xf32>, vector<256x128xf32> -> vector<256x128xf32>
    %56 = arith.addf %50, %55 : vector<256x128xf32>
    %cst_53 = arith.constant 0.000000e+00 : f32
    %57 = vector.broadcast %cst_53 : f32 to vector<256x128xf32>
    %58 = arith.maximumf %56, %57 : vector<256x128xf32>
    %cst_54 = arith.constant 1.000000e+00 : f32
    %59 = vector.broadcast %cst_54 : f32 to vector<1x256xf32>
    %cst_55 = arith.constant dense<0.000000e+00> : vector<1x128xf32>
    %60 = tpu.matmul %59, %58, %cst_55 {dimension_numbers = #tpu.dot_dimension_numbers<[1], [0], [0], [1], [0, 0, 1, 1], [], []>} : vector<1x256xf32>, vector<256x128xf32>, vector<1x128xf32> -> vector<1x128xf32>
    %c0_56 = arith.constant 0 : index
    %c0_57 = arith.constant 0 : index
    %61 = vector.load %arg4[%c0_56, %c0_57] : memref<128x128xf32, #tpu.memory_space<vmem>>, vector<128x128xf32>
    %cst_58 = arith.constant dense<0.000000e+00> : vector<1x128xf32>
    %62 = tpu.matmul %60, %61, %cst_58 {dimension_numbers = #tpu.dot_dimension_numbers<[1], [0], [0], [1], [0, 0, 1, 1], [], []>} : vector<1x128xf32>, vector<128x128xf32>, vector<1x128xf32> -> vector<1x128xf32>
    %c0_59 = arith.constant 0 : index
    %c0_60 = arith.constant 0 : index
    %63 = vector.load %arg5[%c0_59, %c0_60] : memref<1x128xf32, #tpu.memory_space<vmem>>, vector<1x128xf32>
    %64 = arith.addf %62, %63 : vector<1x128xf32>
    %65 = vector.shape_cast %64 : vector<1x128xf32> to vector<1x1x128xf32>
    %c0_61 = arith.constant 0 : index
    %c0_62 = arith.constant 0 : index
    %c0_63 = arith.constant 0 : index
    %66 = vector.load %arg6[%c0_61, %c0_62, %c0_63] : memref<1x1x128xf32, #tpu.memory_space<vmem>>, vector<1x1x128xf32>
    tpu.vector_store %arg6[%c0_61, %c0_62, %c0_63], %65 {strides = array<i32>} : memref<1x1x128xf32, #tpu.memory_space<vmem>>, vector<1x1x128xf32>,
    return
  }
  func.func @transform_0(%arg0: i32) -> (i32, i32, i32, i32) {
    %c0_i32 = arith.constant 0 : i32
    %c0_i32_0 = arith.constant 0 : i32
    %c0_i32_1 = arith.constant 0 : i32
    %c0_i32_2 = arith.constant 0 : i32
    return %arg0, %c0_i32, %c0_i32_0, %c0_i32_1 : i32, i32, i32, i32
  }
  func.func @transform_1(%arg0: i32) -> (i32, i32) {
    %c0_i32 = arith.constant 0 : i32
    %c0_i32_0 = arith.constant 0 : i32
    %c0_i32_1 = arith.constant 0 : i32
    return %c0_i32, %c0_i32_0 : i32, i32
  }
  func.func @transform_2(%arg0: i32) -> (i32, i32) {
    %c0_i32 = arith.constant 0 : i32
    %c0_i32_0 = arith.constant 0 : i32
    %c0_i32_1 = arith.constant 0 : i32
    return %c0_i32, %c0_i32_0 : i32, i32
  }
  func.func @transform_3(%arg0: i32) -> (i32, i32) {
    %c0_i32 = arith.constant 0 : i32
    %c0_i32_0 = arith.constant 0 : i32
    %c0_i32_1 = arith.constant 0 : i32
    return %c0_i32, %c0_i32_0 : i32, i32
  }
  func.func @transform_4(%arg0: i32) -> (i32, i32) {
    %c0_i32 = arith.constant 0 : i32
    %c0_i32_0 = arith.constant 0 : i32
    %c0_i32_1 = arith.constant 0 : i32
    return %c0_i32, %c0_i32_0 : i32, i32
  }
  func.func @transform_5(%arg0: i32) -> (i32, i32, i32) {
    %c0_i32 = arith.constant 0 : i32
    %c0_i32_0 = arith.constant 0 : i32
    %c0_i32_1 = arith.constant 0 : i32
    return %arg0, %c0_i32, %c0_i32_0 : i32, i32, i32
  }
}

</mosaic_0001>

<bundles_post_ra>
// kernel: tpu_custom_call.1
= control target key start
LH: loop header
LB: loop body
LE: loop exit
PB: predicated region body
PF: predicated region fallthrough
CT: control target
= control target key end

     0   :  { %10 = vsyncpa [#allocation3], 0  ;;  %s4992_s0 = inlined_call_operand.vmem [shape: f32[2,18,18,4], index: 0, kind: input, shape index: {}]   ;;  %s4993_s1 = inlined_call_operand.vmem [shape: f32[36,128], index: 1, kind: input, shape index: {}]   ;;  %s4994_s2 = inlined_call_operand.vmem [shape: f32[1,128], index: 2, kind: input, shape index: {}]   ;;  %s4995_s3 = inlined_call_operand.vmem [shape: f32[128,128], index: 3, kind: input, shape index: {}]   ;;  %s4996_s4 = inlined_call_operand.vmem [shape: f32[1,128], index: 4, kind: input, shape index: {}]   ;;  %s4997_s5 = inlined_call_operand.hbm [shape: f32[2,1,128], index: 5, kind: output, shape index: {}]  }
   0x1   :  { %12 = vsyncpa [#allocation3 + $0x1], 0  ;;  %s3537_s18 = smov 0   ;;  %s3539_s19 = smov 0  }
   0x2   :  { %s3541_s20 = smov 0   ;;  %s3543_s21 = smov 0  }
   0x3 LB: > { %s3558_s22 = sadd.s32 4294967295, %s3504_s21   ;;  %s2901_s23 = sadd.s32 4294967294, %s3504_s21   ;;  %s3504_s21 = sphi %s3543_s21, %s5212_s21   ;;  %s3500_s20 = sphi %s3541_s20, %s5211_s20   ;;  %s3496_s19 = sphi %s3539_s19, %s5210_s19   ;;  %s3492_s18 = sphi %s3537_s18, %s5209_s18  }
   0x4   : > { %s3562_s24 = sadd.s32 1, %s3504_s21   ;;  %s135_s25 = sadd.s32 1, %s3500_s20 }
   0x5   : > { %s132_s26 = ssub.s32 %s3504_s21, %s3562_s24  ;;  %p145_p0 = scmp.ne.s32.totalorder %s3500_s20, %s3496_s19 }
   0x6   : > { %p133_p1 = scmp.eq.s32.totalorder %s132_s26, 0  ;;  %p146_p2 = scmp.eq.s32.totalorder %s3558_s22, 1 }
   0x7   : > { %p151_p3 = scmp.ne.s32.totalorder %s3496_s19, %s3492_s18  ;;  %p152_p4 = scmp.eq.s32.totalorder %s2901_s23, 1 }
   0x8   : > { %s3573_s27 = scalar_select %p133_p1, %s3500_s20, %s135_s25  }
   0x9   : > { %p3575_p5 = por %p146_p2, %p145_p0  ;;  %p3579_p6 = por %p152_p4, %p151_p3 }
   0xa   : > { %p2904_p7 = scmp.ge.s32.totalorder %s3504_s21, 1  ;;  %p190_p8 = scmp.lt.s32.totalorder %s3504_s21, 3 }
   0xc   : > { %p191_p9 = pnand %p2904_p7, %p190_p8 }
   0xe   : > { %194 = sbr.rel (%p191_p9) target bundleno = 1038 (0x40e), region = 40 }
  0x13   : > { %v258_v0 = vld [vmem:[%s4993_s1] sm:$0xf]  ;;  %vm356_vm0 = vcmask 1043456   ;;  %p217_p10 = scmp.lt.s32.totalorder %s3558_s22, 1  ;;  %vm259_vm1 = vcmask 31744   ;;  %s2842_s17 = scalar_lea.hbm %s4997_s5, %s3558_s22 }
  0x14   : > { %3397 = vmatpush.msk.msra.mxu1 %vm356_vm0, %v258_v0  ;;  %3398 = vmatpush.msk.msra.mxu2 %vm356_vm0, %v258_v0  ;;  %v537_v17 = vld [vmem:[%s4993_s1 + $0x4] sm:$0xf]  ;;  %v814_v18 = vld [vmem:[%s4993_s1 + $0x8] sm:$0xf]  ;;  %v1092_v23 = vld [vmem:[%s4993_s1 + $0xc] sm:$0xf] }
  0x15   : > { %s218_s7 = scalar_select %p217_p10, %s3558_s22, 1  ;;  %2906 = vmatpush.msk.msra.mxu0 %vm356_vm0, %v258_v0  ;;  %3399 = vmatpush.msk.msra.mxu3 %vm356_vm0, %v258_v0  ;;  %v1369_v28 = vld [vmem:[%s4993_s1 + $0x10] sm:$0xf] }
  0x16   : > { %2939 = vmatpush.msk.msrb.mxu1 %vm356_vm0, %v537_v17  ;;  %2972 = vmatpush.msk.msrb.mxu2 %vm356_vm0, %v814_v18  ;;  %s2846_s6 = sshll.u32 %s2842_s17, 4  ;;  %s3462_s12 = scalar_lea.hbm %s4997_s5, 2  ;;  %s2847_s6 = int_to_ptr.hbm [resolvable:$true] %s2846_s6 }
  0x17   : > { %s3400_s8 = smul.u32 432, %s218_s7  ;;  %3037 = vmatpush.msk.msrb.mxu3 %vm356_vm0, %v1092_v23  ;;  %3102 = vmatpush.msk.msrb.mxu0 %vm356_vm0, %v1369_v28 }
  0x19   : > { %s3597_s11 = scalar_lea.vmem %s4992_s0, %s3400_s8  ;;  %s3456_s8 = sshra.s32 %s2847_s6, 4  ;;  %s3457_s8 = int_to_ptr.hbm [resolvable:$true] %s3456_s8 }
  0x1a   : > { %v3600_v1 = vld [vmem:[%s3597_s11 + $0x68] sm:$0xff]  ;;  %v226_v3 = vld [vmem:[%s3597_s11] sm:$0xff]  ;;  %v3617_v5 = vld [vmem:[%s3597_s11 + $0x78] sm:$0xff]  ;;  %s3458_s9 = scalar_lea.hbm %s3457_s8, 1  ;;  %p3463_p0 = scmp.lt.s32.totalorder %s3457_s8, %s4997_s5 }
  0x1b   : > { %v3603_v2 = vld [vmem:[%s3597_s11 + $0xc8] sm:$0xff]  ;;  %2916 = vmatmul.msk.f32.vlgmr.msra.gmra.mxu1 %vm259_vm1, %v3600_v1  ;;  %2907 = vmatmul.msk.f32.vlgmr.msra.gmra.mxu0 %vm259_vm1, %v226_v3  ;;  %v3620_v6 = vld [vmem:[%s3597_s11 + $0xd8] sm:$0xff]  ;;  %v3634_v9 = vld [vmem:[%s3597_s11 + $0x80] sm:$0xff]  ;;  %p3459_p11 = scmp.ne.s32.totalorder %s3457_s8, %s3458_s9  ;;  %p3464_p1 = scmp.lt.s32.totalorder %s3462_s12, %s3458_s9 }
  0x1c   : > { %2924 = vmatmul.msk.f32.vlgmr.msra.gmra.mxu2 %vm259_vm1, %v3603_v2  ;;  %v3612_v4 = vld [vmem:[%s3597_s11 + $0x128] sm:$0xff]  ;;  %v3624_v8 = vld [vmem:[%s3597_s11 + $0x138] sm:$0xff]  ;;  %v3637_v10 = vld [vmem:[%s3597_s11 + $0xe0] sm:$0xff] }
  0x1d   : > { %2932 = vmatmul.msk.f32.vlgmr.msra.gmra.mxu3 %vm259_vm1, %v3612_v4  ;;  %v227_v7 = vld [vmem:[%s3597_s11 + $0x8] sm:$0xff]  ;;  %v228_v11 = vld [vmem:[%s3597_s11 + $0x18] sm:$0xff]  ;;  %v3641_v12 = vld [vmem:[%s3597_s11 + $0x140] sm:$0xff]  ;;  %p3460_p12 = pnand %p3459_p11, %p3575_p5  ;;  %p3465_p2 = por %p3464_p1, %p3463_p0 }
  0x1e   : > { %v3651_v13 = vld [vmem:[%s3597_s11 + $0x90] sm:$0xff]  ;;  %v229_v15 = vld [vmem:[%s3597_s11 + $0x20] sm:$0xff]  ;;  %v3676_v19 = vld [vmem:[%s3597_s11 + $0x98] sm:$0xff] }
  0x1f   : > { %v3654_v14 = vld [vmem:[%s3597_s11 + $0xf0] sm:$0xff]  ;;  %v3679_v20 = vld [vmem:[%s3597_s11 + $0xf8] sm:$0xff]  ;;  %v3700_v24 = vld [vmem:[%s3597_s11 + $0xa8] sm:$0xff]  ;;  %p3461_p13 = pneg %p3460_p12 }
  0x20   : > { %v3658_v16 = vld [vmem:[%s3597_s11 + $0x150] sm:$0xff]  ;;  %v3685_v22 = vld [vmem:[%s3597_s11 + $0x158] sm:$0xff]  ;;  %v3703_v25 = vld [vmem:[%s3597_s11 + $0x108] sm:$0xff] }
  0x21   : > { %v3682_v21 = vld [vmem:[%s3597_s11 + $0x30] sm:$0xff]  ;;  %v3706_v26 = vld [vmem:[%s3597_s11 + $0x38] sm:$0xff]  ;;  %v3709_v27 = vld [vmem:[%s3597_s11 + $0x168] sm:$0xff]  ;;  %p3466_p3 = pnand %p3465_p2, %p3461_p13 }
  0x22   : > { %v3724_v29 = vld [vmem:[%s3597_s11 + $0xb0] sm:$0xff]  ;;  %v232_v31 = vld [vmem:[%s3597_s11 + $0x48] sm:$0xff]  ;;  %v3741_v33 = vld [vmem:[%s3597_s11 + $0xc0] sm:$0xff] }
  0x23   : > { %2917 = vmatmul.msk.f32.gmra.mxu1 %vm259_vm1, %v3617_v5  ;;  %2908 = vmatmul.msk.f32.gmra.mxu0 %vm259_vm1, %v227_v7  ;;  %v3727_v30 = vld [vmem:[%s3597_s11 + $0x110] sm:$0xff]  ;;  %v3744_v34 = vld [vmem:[%s3597_s11 + $0x120] sm:$0xff] }
  0x24   : > { %2925 = vmatmul.msk.f32.gmra.mxu2 %vm259_vm1, %v3620_v6  ;;  %v3731_v32 = vld [vmem:[%s3597_s11 + $0x170] sm:$0xff]  ;;  %v505_v36 = vld [vmem:[%s3597_s11 + $0x1] sm:$0xff]  ;;  %v3070_v41 = vld [vmem:[%s3597_s11 + $0x19] sm:$0xff] }
  0x25   : > { %2933 = vmatmul.msk.f32.gmra.mxu3 %vm259_vm1, %v3624_v8  ;;  %v233_v35 = vld [vmem:[%s3597_s11 + $0x50] sm:$0xff]  ;;  %v782_v37 = vld [vmem:[%s3597_s11 + $0x2] sm:$0xff]  ;;  %v3769_v42 = vld [vmem:[%s3597_s11 + $0x1a] sm:$0xff] }
  0x26   : > { %v234_v38 = vld [vmem:[%s3597_s11 + $0x60] sm:$0xff]  ;;  %v506_v39 = vld [vmem:[%s3597_s11 + $0x9] sm:$0xff]  ;;  %v3782_v45 = vld [vmem:[%s3597_s11 + $0x31] sm:$0xff] }
  0x27   : > { %v783_v40 = vld [vmem:[%s3597_s11 + $0xa] sm:$0xff]  ;;  %v3071_v43 = vld [vmem:[%s3597_s11 + $0x21] sm:$0xff]  ;;  %v3791_v46 = vld [vmem:[%s3597_s11 + $0x32] sm:$0xff] }
  0x28   : > { %v3779_v44 = vld [vmem:[%s3597_s11 + $0x22] sm:$0xff]  ;;  %v3794_v47 = vld [vmem:[%s3597_s11 + $0x39] sm:$0xff]  ;;  %v3817_v50 = vld [vmem:[%s3597_s11 + $0x4a] sm:$0xff] }
  0x29   : > { %v3804_v48 = vld [vmem:[%s3597_s11 + $0x3a] sm:$0xff]  ;;  %v3807_v49 = vld [vmem:[%s3597_s11 + $0x49] sm:$0xff]  ;;  %v3820_v51 = vld [vmem:[%s3597_s11 + $0x51] sm:$0xff] }
  0x2a   : > { %v3831_v52 = vld [vmem:[%s3597_s11 + $0x52] sm:$0xff]  ;;  %v3834_v53 = vld [vmem:[%s3597_s11 + $0x61] sm:$0xff]  ;;  %v3852_v57 = vld [vmem:[%s3597_s11 + $0x69] sm:$0xff] }
  0x2b   : > { %2918 = vmatmul.msk.f32.gmra.mxu1 %vm259_vm1, %v3634_v9  ;;  %2909 = vmatmul.msk.f32.gmra.mxu0 %vm259_vm1, %v228_v11  ;;  %v3847_v55 = vld [vmem:[%s3597_s11 + $0x62] sm:$0xff]  ;;  %v3867_v60 = vld [vmem:[%s3597_s11 + $0x6a] sm:$0xff]  ;;  %v3874_v63 = vld [vmem:[%s3597_s11 + $0x79] sm:$0xff] }
  0x2c   : > { %2926 = vmatmul.msk.f32.gmra.mxu2 %vm259_vm1, %v3637_v10  ;;  %5031 = vst [vmem:[#allocation5_spill] sm:$0xff] %v3867_v60  ;;  %v3889_v3 = vld [vmem:[%s3597_s11 + $0x7a] sm:$0xff]  ;;  %v3918_v23 = vld [vmem:[%s3597_s11 + $0x91] sm:$0xff] }
  0x2d   : > { %2934 = vmatmul.msk.f32.gmra.mxu3 %vm259_vm1, %v3641_v12  ;;  %5033 = vst [vmem:[#allocation7_spill] sm:$0xff] %v3889_v3 }
  0x2e   : > { %5038 = vst [vmem:[#allocation12_spill] sm:$0xff] %v3918_v23 }
  0x33   : > { %2919 = vmatmul.msk.f32.gmra.mxu1 %vm259_vm1, %v3651_v13  ;;  %2910 = vmatmul.msk.f32.gmra.mxu0 %vm259_vm1, %v229_v15 }
  0x34   : > { %2927 = vmatmul.msk.f32.gmra.mxu2 %vm259_vm1, %v3654_v14 }
  0x35   : > { %2935 = vmatmul.msk.f32.gmra.mxu3 %vm259_vm1, %v3658_v16 }
  0x3b   : > { %2920 = vmatmul.msk.f32.gmra.mxu1 %vm259_vm1, %v3676_v19  ;;  %2911 = vmatmul.msk.f32.gmra.mxu0 %vm259_vm1, %v3682_v21 }
  0x3c   : > { %2928 = vmatmul.msk.f32.gmra.mxu2 %vm259_vm1, %v3679_v20 }
  0x3d   : > { %2936 = vmatmul.msk.f32.gmra.mxu3 %vm259_vm1, %v3685_v22 }
  0x43   : > { %2921 = vmatmul.msk.f32.gmra.mxu1 %vm259_vm1, %v3700_v24  ;;  %2912 = vmatmul.msk.f32.gmra.mxu0 %vm259_vm1, %v3706_v26 }
  0x44   : > { %2929 = vmatmul.msk.f32.gmra.mxu2 %vm259_vm1, %v3703_v25 }
  0x45   : > { %2937 = vmatmul.msk.f32.gmra.mxu3 %vm259_vm1, %v3709_v27 }
  0x4b   : > { %2922 = vmatmul.msk.f32.gmra.mxu1 %vm259_vm1, %v3724_v29  ;;  %2913 = vmatmul.msk.f32.gmra.mxu0 %vm259_vm1, %v232_v31 }
  0x4c   : > { %2930 = vmatmul.msk.f32.gmra.mxu2 %vm259_vm1, %v3727_v30 }
  0x4d   : > { %2938 = vmatmul.msk.f32.gmra.mxu3 %vm259_vm1, %v3731_v32 }
  0x53   : > { %2923 = vmatmul.msk.f32.gmra.mxu1 %vm259_vm1, %v3741_v33  ;;  %2914 = vmatmul.msk.f32.gmra.mxu0 %vm259_vm1, %v233_v35 }
  0x54   : > { %2931 = vmatmul.msk.f32.gmra.mxu2 %vm259_vm1, %v3744_v34 }
  0x55   : > { %3038 = vmatmul.msk.f32.vlgmr.msrb.gmra.mxu3 %vm259_vm1, %v228_v11 }
  0x5b   : > { %2940 = vmatmul.msk.f32.vlgmr.msrb.gmra.mxu1 %vm259_vm1, %v505_v36  ;;  %2915 = vmatmul.msk.f32.gmra.mxu0 %vm259_vm1, %v234_v38 }
  0x5c   : > { %2973 = vmatmul.msk.f32.vlgmr.msrb.gmra.mxu2 %vm259_vm1, %v782_v37  ;;  %v3940_v37 = vld [vmem:[%s3597_s11 + $0x99] sm:$0xff] }
  0x5d   : > { %3039 = vmatmul.msk.f32.gmra.mxu3 %vm259_vm1, %v229_v15  ;;  %v3911_v15 = vld [vmem:[%s3597_s11 + $0x82] sm:$0xff]  ;;  %5041 = vst [vmem:[#allocation15_spill] sm:$0xff] %v3940_v37 }
  0x5e   : > { %5036 = vst [vmem:[#allocation10_spill] sm:$0xff] %v3911_v15 }
  0x63   : > { %2941 = vmatmul.msk.f32.gmra.mxu1 %vm259_vm1, %v506_v39  ;;  %3103 = vmatmul.msk.f32.vlgmr.msrb.gmra.mxu0 %vm259_vm1, %v3070_v41  ;;  %v3955_v39 = vld [vmem:[%s3597_s11 + $0x9a] sm:$0xff] }
  0x64   : > { %2974 = vmatmul.msk.f32.gmra.mxu2 %vm259_vm1, %v783_v40  ;;  %5042 = vst [vmem:[#allocation16_spill] sm:$0xff] %v3955_v39 }
  0x65   : > { %3040 = vmatmul.msk.f32.gmra.mxu3 %vm259_vm1, %v3682_v21 }
  0x6b   : > { %2942 = vmatmul.msk.f32.gmra.mxu1 %vm259_vm1, %v3070_v41  ;;  %3104 = vmatmul.msk.f32.gmra.mxu0 %vm259_vm1, %v3071_v43 }
  0x6c   : > { %2975 = vmatmul.msk.f32.gmra.mxu2 %vm259_vm1, %v3769_v42 }
  0x6d   : > { %3041 = vmatmul.msk.f32.gmra.mxu3 %vm259_vm1, %v3706_v26 }
  0x73   : > { %2943 = vmatmul.msk.f32.gmra.mxu1 %vm259_vm1, %v3071_v43  ;;  %3105 = vmatmul.msk.f32.gmra.mxu0 %vm259_vm1, %v3782_v45  ;;  %v3962_v43 = vld [vmem:[%s3597_s11 + $0xa9] sm:$0xff] }
  0x74   : > { %2976 = vmatmul.msk.f32.gmra.mxu2 %vm259_vm1, %v3779_v44  ;;  %5044 = vst [vmem:[#allocation18_spill] sm:$0xff] %v3962_v43 }
  0x75   : > { %3042 = vmatmul.msk.f32.gmra.mxu3 %vm259_vm1, %v232_v31  ;;  %v3933_v31 = vld [vmem:[%s3597_s11 + $0x92] sm:$0xff] }
  0x76   : > { %5039 = vst [vmem:[#allocation13_spill] sm:$0xff] %v3933_v31 }
  0x7b   : > { %2944 = vmatmul.msk.f32.gmra.mxu1 %vm259_vm1, %v3782_v45  ;;  %3106 = vmatmul.msk.f32.gmra.mxu0 %vm259_vm1, %v3794_v47 }
  0x7c   : > { %2977 = vmatmul.msk.f32.gmra.mxu2 %vm259_vm1, %v3791_v46 }
  0x7d   : > { %3043 = vmatmul.msk.f32.gmra.mxu3 %vm259_vm1, %v233_v35 }
  0x83   : > { %2945 = vmatmul.msk.f32.gmra.mxu1 %vm259_vm1, %v3794_v47  ;;  %3107 = vmatmul.msk.f32.gmra.mxu0 %vm259_vm1, %v3807_v49 }
  0x84   : > { %2978 = vmatmul.msk.f32.gmra.mxu2 %vm259_vm1, %v3804_v48 }
  0x85   : > { %3044 = vmatmul.msk.f32.gmra.mxu3 %vm259_vm1, %v234_v38 }
  0x8b   : > { %2946 = vmatmul.msk.f32.gmra.mxu1 %vm259_vm1, %v3807_v49  ;;  %3108 = vmatmul.msk.f32.gmra.mxu0 %vm259_vm1, %v3820_v51 }
  0x8c   : > { %2979 = vmatmul.msk.f32.gmra.mxu2 %vm259_vm1, %v3817_v50 }
  0x8d   : > { %3045 = vmatmul.msk.f32.gmra.mxu3 %vm259_vm1, %v3600_v1 }
  0x93   : > { %2947 = vmatmul.msk.f32.gmra.mxu1 %vm259_vm1, %v3820_v51  ;;  %3109 = vmatmul.msk.f32.gmra.mxu0 %vm259_vm1, %v3834_v53 }
  0x94   : > { %2980 = vmatmul.msk.f32.gmra.mxu2 %vm259_vm1, %v3831_v52 }
  0x95   : > { %3046 = vmatmul.msk.f32.gmra.mxu3 %vm259_vm1, %v3617_v5 }
  0x98   : > { %v3844_v54 = vpop.f32.mrf.mxu1  ;;  %v3849_v56 = vpop.f32.mrf.mxu0 }
  0x9b   : > { %2948 = vmatmul.msk.f32.gmra.mxu1 %vm259_vm1, %v3834_v53  ;;  %3110 = vmatmul.msk.f32.gmra.mxu0 %vm259_vm1, %v3852_v57 }
  0x9c   : > { %2981 = vmatmul.msk.f32.gmra.mxu2 %vm259_vm1, %v3847_v55 }
  0x9d   : > { %3047 = vmatmul.msk.f32.gmra.mxu3 %vm259_vm1, %v3634_v9  ;;  %v3896_v9 = vld [vmem:[%s3597_s11 + $0x81] sm:$0xff] }
  0x9e   : > { %5035 = vst [vmem:[#allocation9_spill] sm:$0xff] %v3896_v9 }
  0x9f   : > { %v3862_v58 = vpop.f32.mrf.mxu2 }
  0xa0   : > { %v3864_v59 = vpop.f32.mrf.mxu1  ;;  %v3869_v61 = vpop.f32.mrf.mxu3 }
  0xa1   : > { %5032 = vst [vmem:[#allocation6_spill] sm:$0xff] %v3869_v61  ;;  %v3871_v62 = vpop.f32.mrf.mxu0 }
  0xa3   : > { %2949 = vmatmul.msk.f32.gmra.mxu1 %vm259_vm1, %v3852_v57  ;;  %3111 = vmatmul.msk.f32.gmra.mxu0 %vm259_vm1, %v3874_v63 }
  0xa4   : > { %2982 = vmatmul.msk.f32.gmra.mxu2 %vm259_vm1, %v3867_v60  ;;  %v4042_v60 = vld [vmem:[%s3597_s11 + $0xca] sm:$0xff] }
  0xa5   : > { %3048 = vmatmul.msk.f32.gmra.mxu3 %vm259_vm1, %v3651_v13 }
  0xa7   : > { %v3884_v0 = vpop.f32.mrf.mxu2 }
  0xa8   : > { %v3886_v1 = vpop.f32.mrf.mxu1  ;;  %v3891_v5 = vpop.f32.mrf.mxu3 }
  0xa9   : > { %5034 = vst [vmem:[#allocation8_spill] sm:$0xff] %v3891_v5  ;;  %v3893_v7 = vpop.f32.mrf.mxu0 }
  0xab   : > { %2950 = vmatmul.msk.f32.gmra.mxu1 %vm259_vm1, %v3874_v63  ;;  %3112 = vmatmul.msk.f32.gmra.mxu0 %vm259_vm1, %v3896_v9 }
  0xac   : > { %2983 = vmatmul.msk.f32.gmra.mxu2 %vm259_vm1, %v3889_v3 }
  0xad   : > { %3049 = vmatmul.msk.f32.gmra.mxu3 %vm259_vm1, %v3676_v19 }
  0xaf   : > { %v3906_v11 = vpop.f32.mrf.mxu2 }
  0xb0   : > { %v3908_v13 = vpop.f32.mrf.mxu1  ;;  %v3913_v17 = vpop.f32.mrf.mxu3 }
  0xb1   : > { %5037 = vst [vmem:[#allocation11_spill] sm:$0xff] %v3913_v17  ;;  %v3915_v18 = vpop.f32.mrf.mxu0 }
  0xb3   : > { %2951 = vmatmul.msk.f32.gmra.mxu1 %vm259_vm1, %v3896_v9  ;;  %3113 = vmatmul.msk.f32.gmra.mxu0 %vm259_vm1, %v3918_v23 }
  0xb4   : > { %2984 = vmatmul.msk.f32.gmra.mxu2 %vm259_vm1, %v3911_v15  ;;  %v4024_v15 = vld [vmem:[%s3597_s11 + $0xc2] sm:$0xff] }
  0xb5   : > { %3050 = vmatmul.msk.f32.gmra.mxu3 %vm259_vm1, %v3700_v24  ;;  %5054 = vst [vmem:[#allocation28_spill] sm:$0xff] %v4024_v15 }
  0xb7   : > { %v3928_v19 = vpop.f32.mrf.mxu2 }
  0xb8   : > { %v3930_v28 = vpop.f32.mrf.mxu1  ;;  %v3935_v35 = vpop.f32.mrf.mxu3 }
  0xb9   : > { %5040 = vst [vmem:[#allocation14_spill] sm:$0xff] %v3935_v35  ;;  %v3937_v36 = vpop.f32.mrf.mxu0  ;;  %v3977_v35 = vld [vmem:[%s3597_s11 + $0xaa] sm:$0xff] }
  0xba   : > { %5046 = vst [vmem:[#allocation20_spill] sm:$0xff] %v3977_v35 }
  0xbb   : > { %2952 = vmatmul.msk.f32.gmra.mxu1 %vm259_vm1, %v3918_v23  ;;  %3114 = vmatmul.msk.f32.gmra.mxu0 %vm259_vm1, %v3940_v37  ;;  %v4029_v23 = vld [vmem:[%s3597_s11 + $0xc9] sm:$0xff] }
  0xbc   : > { %2985 = vmatmul.msk.f32.gmra.mxu2 %vm259_vm1, %v3933_v31  ;;  %v3984_v31 = vld [vmem:[%s3597_s11 + $0xb1] sm:$0xff] }
  0xbd   : > { %3051 = vmatmul.msk.f32.gmra.mxu3 %vm259_vm1, %v3724_v29  ;;  %5048 = vst [vmem:[#allocation22_spill] sm:$0xff] %v3984_v31 }
  0xbf   : > { %v3950_v24 = vpop.f32.mrf.mxu2 }
  0xc0   : > { %v3952_v38 = vpop.f32.mrf.mxu1  ;;  %v3957_v40 = vpop.f32.mrf.mxu3 }
  0xc1   : > { %5043 = vst [vmem:[#allocation17_spill] sm:$0xff] %v3957_v40  ;;  %v3959_v41 = vpop.f32.mrf.mxu0 }
  0xc3   : > { %2953 = vmatmul.msk.f32.gmra.mxu1 %vm259_vm1, %v3940_v37  ;;  %3115 = vmatmul.msk.f32.gmra.mxu0 %vm259_vm1, %v3962_v43  ;;  %v4006_v37 = vld [vmem:[%s3597_s11 + $0xc1] sm:$0xff] }
  0xc4   : > { %2986 = vmatmul.msk.f32.gmra.mxu2 %vm259_vm1, %v3955_v39  ;;  %v3999_v39 = vld [vmem:[%s3597_s11 + $0xb2] sm:$0xff]  ;;  %5052 = vst [vmem:[#allocation26_spill] sm:$0xff] %v4006_v37 }
  0xc5   : > { %3052 = vmatmul.msk.f32.gmra.mxu3 %vm259_vm1, %v3741_v33  ;;  %5050 = vst [vmem:[#allocation24_spill] sm:$0xff] %v3999_v39 }
  0xc7   : > { %v3972_v29 = vpop.f32.mrf.mxu2 }
  0xc8   : > { %5045 = vst [vmem:[#allocation19_spill] sm:$0xff] %v3972_v29  ;;  %v3974_v40 = vpop.f32.mrf.mxu1  ;;  %v3979_v17 = vpop.f32.mrf.mxu3 }
  0xc9   : > { %5047 = vst [vmem:[#allocation21_spill] sm:$0xff] %v3979_v17  ;;  %v3981_v5 = vpop.f32.mrf.mxu0 }
  0xcb   : > { %2954 = vmatmul.msk.f32.gmra.mxu1 %vm259_vm1, %v3962_v43  ;;  %3116 = vmatmul.msk.f32.gmra.mxu0 %vm259_vm1, %v3984_v31 }
  0xcc   : > { %2987 = vmatmul.msk.f32.gmra.mxu2 %vm259_vm1, %v3977_v35 }
  0xcd   : > { %3053 = vmatmul.msk.f32.gmra.mxu3 %vm259_vm1, %v3603_v2 }
  0xcf   : > { %v3994_v33 = vpop.f32.mrf.mxu2 }
  0xd0   : > { %5049 = vst [vmem:[#allocation23_spill] sm:$0xff] %v3994_v33  ;;  %v3996_v17 = vpop.f32.mrf.mxu1  ;;  %v4001_v61 = vpop.f32.mrf.mxu3 }
  0xd1   : > { %5051 = vst [vmem:[#allocation25_spill] sm:$0xff] %v4001_v61  ;;  %v4003_v43 = vpop.f32.mrf.mxu0  ;;  %v4021_v61 = vld [vmem:[%s4994_s2] ss:$0 sm:$0xff] }
  0xd3   : > { %2955 = vmatmul.msk.f32.gmra.mxu1 %vm259_vm1, %v3984_v31  ;;  %3117 = vmatmul.msk.f32.gmra.mxu0 %vm259_vm1, %v4006_v37 }
  0xd4   : > { %2988 = vmatmul.msk.f32.gmra.mxu2 %vm259_vm1, %v3999_v39 }
  0xd5   : > { %3054 = vmatmul.msk.f32.gmra.mxu3 %vm259_vm1, %v3620_v6  ;;  %v473_v6 = vadd.f32 %v4021_v61, %v3849_v56 }
  0xd7   : > { %v4016_v2 = vpop.f32.mrf.mxu2 }
  0xd8   : > { %5053 = vst [vmem:[#allocation27_spill] sm:$0xff] %v4016_v2  ;;  %v654_v35 = vpop.f32.mrf.mxu1  ;;  %v1209_v31 = vpop.f32.mrf.mxu3 }
  0xd9   : > { %v4026_v39 = vpop.f32.mrf.mxu0  ;;  %v750_v2 = vadd.f32 %v654_v35, %v473_v6  ;;  %v474_v35 = vadd.f32 %v4021_v61, %v3871_v62 }
  0xdb   : > { %2956 = vmatmul.msk.f32.gmra.mxu1 %vm259_vm1, %v4006_v37  ;;  %3118 = vmatmul.msk.f32.gmra.mxu0 %vm259_vm1, %v4029_v23 }
  0xdc   : > { %2989 = vmatmul.msk.f32.gmra.mxu2 %vm259_vm1, %v4024_v15  ;;  %v4049_v15 = vld [vmem:[%s3597_s11 + $0xd9] sm:$0xff] }
  0xdd   : > { %3055 = vmatmul.msk.f32.gmra.mxu3 %vm259_vm1, %v3637_v10 }
  0xdf   : > { %v931_v3 = vpop.f32.mrf.mxu2 }
  0xe0   : > { %v1027_v33 = vadd.f32 %v931_v3, %v750_v2  ;;  %v657_v9 = vpop.f32.mrf.mxu1  ;;  %v1212_v56 = vpop.f32.mrf.mxu3  ;;  %v4062_v2 = vld [vmem:[%s3597_s11 + $0xda] sm:$0xff] }
  0xe1   : > { %v4046_v37 = vpop.f32.mrf.mxu0  ;;  %v751_v10 = vadd.f32 %v657_v9, %v474_v35  ;;  %v475_v9 = vadd.f32 %v4021_v61, %v3893_v7 }
  0xe2   : > { %v4044_v29 = vadd.f32 %v1209_v31, %v1027_v33  ;;  %5056 = vst [vmem:[#allocation30_spill] sm:$0xff] %v4046_v37 }
  0xe3   : > { %2957 = vmatmul.msk.f32.gmra.mxu1 %vm259_vm1, %v4029_v23  ;;  %3119 = vmatmul.msk.f32.gmra.mxu0 %vm259_vm1, %v4049_v15 }
  0xe4   : > { %5055 = vst [vmem:[#allocation29_spill] sm:$0xff] %v4044_v29  ;;  %2990 = vmatmul.msk.f32.gmra.mxu2 %vm259_vm1, %v4042_v60  ;;  %v4069_v29 = vld [vmem:[%s3597_s11 + $0xe1] sm:$0xff] }
  0xe5   : > { %3056 = vmatmul.msk.f32.gmra.mxu3 %vm259_vm1, %v3654_v14 }
  0xe7   : > { %v934_v3 = vpop.f32.mrf.mxu2 }
  0xe8   : > { %v1028_v31 = vadd.f32 %v934_v3, %v751_v10  ;;  %v660_v33 = vpop.f32.mrf.mxu1  ;;  %v1215_v62 = vpop.f32.mrf.mxu3  ;;  %v4082_v3 = vld [vmem:[%s3597_s11 + $0xe2] sm:$0xff] }
  0xe9   : > { %v4066_v37 = vpop.f32.mrf.mxu0  ;;  %v752_v14 = vadd.f32 %v660_v33, %v475_v9  ;;  %v476_v33 = vadd.f32 %v4021_v61, %v3915_v18 }
  0xea   : > { %v4064_v6 = vadd.f32 %v1212_v56, %v1028_v31  ;;  %5058 = vst [vmem:[#allocation32_spill] sm:$0xff] %v4066_v37 }
  0xeb   : > { %2958 = vmatmul.msk.f32.gmra.mxu1 %vm259_vm1, %v4049_v15  ;;  %3120 = vmatmul.msk.f32.gmra.mxu0 %vm259_vm1, %v4069_v29 }
  0xec   : > { %5057 = vst [vmem:[#allocation31_spill] sm:$0xff] %v4064_v6  ;;  %2991 = vmatmul.msk.f32.gmra.mxu2 %vm259_vm1, %v4062_v2  ;;  %v4089_v6 = vld [vmem:[%s3597_s11 + $0xf1] sm:$0xff] }
  0xed   : > { %3057 = vmatmul.msk.f32.gmra.mxu3 %vm259_vm1, %v3679_v20 }
  0xef   : > { %v937_v56 = vpop.f32.mrf.mxu2 }
  0xf0   : > { %v1029_v35 = vadd.f32 %v937_v56, %v752_v14  ;;  %v663_v10 = vpop.f32.mrf.mxu1  ;;  %v1218_v7 = vpop.f32.mrf.mxu3  ;;  %v4102_v56 = vld [vmem:[%s3597_s11 + $0xf2] sm:$0xff] }
  0xf1   : > { %v4086_v37 = vpop.f32.mrf.mxu0  ;;  %v753_v20 = vadd.f32 %v663_v10, %v476_v33  ;;  %v477_v10 = vadd.f32 %v4021_v61, %v3937_v36 }
  0xf2   : > { %v4084_v31 = vadd.f32 %v1215_v62, %v1029_v35  ;;  %5060 = vst [vmem:[#allocation34_spill] sm:$0xff] %v4086_v37 }
  0xf3   : > { %2959 = vmatmul.msk.f32.gmra.mxu1 %vm259_vm1, %v4069_v29  ;;  %3121 = vmatmul.msk.f32.gmra.mxu0 %vm259_vm1, %v4089_v6 }
  0xf4   : > { %5059 = vst [vmem:[#allocation33_spill] sm:$0xff] %v4084_v31  ;;  %2992 = vmatmul.msk.f32.gmra.mxu2 %vm259_vm1, %v4082_v3  ;;  %v4109_v31 = vld [vmem:[%s3597_s11 + $0xf9] sm:$0xff] }
  0xf5   : > { %3058 = vmatmul.msk.f32.gmra.mxu3 %vm259_vm1, %v3703_v25 }
  0xf7   : > { %v940_v62 = vpop.f32.mrf.mxu2 }
  0xf8   : > { %v1030_v9 = vadd.f32 %v940_v62, %v753_v20  ;;  %v666_v14 = vpop.f32.mrf.mxu1  ;;  %v1221_v18 = vpop.f32.mrf.mxu3  ;;  %v4122_v62 = vld [vmem:[%s3597_s11 + $0xfa] sm:$0xff] }
  0xf9   : > { %v4106_v37 = vpop.f32.mrf.mxu0  ;;  %v754_v25 = vadd.f32 %v666_v14, %v477_v10  ;;  %v478_v14 = vadd.f32 %v4021_v61, %v3959_v41 }
  0xfa   : > { %v4104_v35 = vadd.f32 %v1218_v7, %v1030_v9  ;;  %5062 = vst [vmem:[#allocation36_spill] sm:$0xff] %v4106_v37 }
  0xfb   : > { %2960 = vmatmul.msk.f32.gmra.mxu1 %vm259_vm1, %v4089_v6  ;;  %3122 = vmatmul.msk.f32.gmra.mxu0 %vm259_vm1, %v4109_v31 }
  0xfc   : > { %5061 = vst [vmem:[#allocation35_spill] sm:$0xff] %v4104_v35  ;;  %2993 = vmatmul.msk.f32.gmra.mxu2 %vm259_vm1, %v4102_v56  ;;  %v4129_v35 = vld [vmem:[%s3597_s11 + $0x109] sm:$0xff] }
  0xfd   : > { %3059 = vmatmul.msk.f32.gmra.mxu3 %vm259_vm1, %v3727_v30 }
  0xff   : > { %v943_v7 = vpop.f32.mrf.mxu2 }
 0x100   : > { %v1031_v33 = vadd.f32 %v943_v7, %v754_v25  ;;  %v669_v20 = vpop.f32.mrf.mxu1  ;;  %v1224_v36 = vpop.f32.mrf.mxu3  ;;  %v4142_v7 = vld [vmem:[%s3597_s11 + $0x10a] sm:$0xff] }
 0x101   : > { %v4126_v37 = vpop.f32.mrf.mxu0  ;;  %v755_v30 = vadd.f32 %v669_v20, %v478_v14  ;;  %v479_v20 = vadd.f32 %v4021_v61, %v3981_v5 }
 0x102   : > { %v4124_v9 = vadd.f32 %v1221_v18, %v1031_v33  ;;  %5064 = vst [vmem:[#allocation38_spill] sm:$0xff] %v4126_v37 }
 0x103   : > { %2961 = vmatmul.msk.f32.gmra.mxu1 %vm259_vm1, %v4109_v31  ;;  %3123 = vmatmul.msk.f32.gmra.mxu0 %vm259_vm1, %v4129_v35 }
 0x104   : > { %5063 = vst [vmem:[#allocation37_spill] sm:$0xff] %v4124_v9  ;;  %2994 = vmatmul.msk.f32.gmra.mxu2 %vm259_vm1, %v4122_v62  ;;  %v4149_v9 = vld [vmem:[%s3597_s11 + $0x111] sm:$0xff] }
 0x105   : > { %3060 = vmatmul.msk.f32.gmra.mxu3 %vm259_vm1, %v3744_v34 }
 0x107   : > { %v946_v18 = vpop.f32.mrf.mxu2 }
 0x108   : > { %v1032_v10 = vadd.f32 %v946_v18, %v755_v30  ;;  %v672_v25 = vpop.f32.mrf.mxu1  ;;  %v1227_v41 = vpop.f32.mrf.mxu3  ;;  %v4162_v18 = vld [vmem:[%s3597_s11 + $0x112] sm:$0xff] }
 0x109   : > { %v4146_v37 = vpop.f32.mrf.mxu0  ;;  %v756_v34 = vadd.f32 %v672_v25, %v479_v20  ;;  %5067 = vst [vmem:[#allocation41_spill] sm:$0xff] %v4162_v18  ;;  %v480_v25 = vadd.f32 %v4021_v61, %v4003_v43 }
 0x10a   : > { %v4144_v33 = vadd.f32 %v1224_v36, %v1032_v10  ;;  %5066 = vst [vmem:[#allocation40_spill] sm:$0xff] %v4146_v37 }
 0x10b   : > { %2962 = vmatmul.msk.f32.gmra.mxu1 %vm259_vm1, %v4129_v35  ;;  %3124 = vmatmul.msk.f32.gmra.mxu0 %vm259_vm1, %v4149_v9 }
 0x10c   : > { %5065 = vst [vmem:[#allocation39_spill] sm:$0xff] %v4144_v33  ;;  %2995 = vmatmul.msk.f32.gmra.mxu2 %vm259_vm1, %v4142_v7  ;;  %v4169_v33 = vld [vmem:[%s3597_s11 + $0x121] sm:$0xff] }
 0x10d   : > { %3061 = vmatmul.msk.f32.gmra.mxu3 %vm259_vm1, %v3612_v4 }
 0x10f   : > { %v949_v36 = vpop.f32.mrf.mxu2 }
 0x110   : > { %v1033_v14 = vadd.f32 %v949_v36, %v756_v34  ;;  %v675_v30 = vpop.f32.mrf.mxu1  ;;  %v1230_v5 = vpop.f32.mrf.mxu3  ;;  %v4182_v36 = vld [vmem:[%s3597_s11 + $0x122] sm:$0xff] }
 0x111   : > { %v4166_v37 = vpop.f32.mrf.mxu0  ;;  %v757_v4 = vadd.f32 %v675_v30, %v480_v25  ;;  %v2201_v25 = vld [vmem:[%s4993_s1 + $0x1c] sm:$0xf] }
 0x112   : > { %v4164_v10 = vadd.f32 %v1227_v41, %v1033_v14  ;;  %5069 = vst [vmem:[#allocation43_spill] sm:$0xff] %v4166_v37  ;;  %3297 = vmatpush.msk.msra.mxu3 %vm356_vm0, %v2201_v25  ;;  %v4237_v25 = vld [vmem:[%s3597_s11 + $0x13a] sm:$0xff] }
 0x113   : > { %2963 = vmatmul.msk.f32.gmra.mxu1 %vm259_vm1, %v4149_v9  ;;  %3125 = vmatmul.msk.f32.gmra.mxu0 %vm259_vm1, %v4169_v33 }
 0x114   : > { %5068 = vst [vmem:[#allocation42_spill] sm:$0xff] %v4164_v10  ;;  %2996 = vmatmul.msk.f32.gmra.mxu2 %vm259_vm1, %v4162_v18  ;;  %v4189_v10 = vld [vmem:[%s3597_s11 + $0x129] sm:$0xff]  ;;  %v481_v18 = vadd.f32 %v4021_v61, %v4026_v39 }
 0x115   : > { %3062 = vmatmul.msk.f32.gmra.mxu3 %vm259_vm1, %v3624_v8  ;;  %v1924_v8 = vld [vmem:[%s4993_s1 + $0x18] sm:$0xf] }
 0x116   : > { %3232 = vmatpush.msk.msra.mxu2 %vm356_vm0, %v1924_v8 }
 0x117   : > { %v952_v41 = vpop.f32.mrf.mxu2 }
 0x118   : > { %v1034_v20 = vadd.f32 %v952_v41, %v757_v4  ;;  %v678_v34 = vpop.f32.mrf.mxu1  ;;  %v1233_v14 = vpop.f32.mrf.mxu3  ;;  %v4209_v41 = vld [vmem:[%s3597_s11 + $0x12a] sm:$0xff] }
 0x119   : > { %v4186_v37 = vpop.f32.mrf.mxu0  ;;  %v758_v30 = vadd.f32 %v678_v34, %v481_v18  ;;  %v4217_v18 = vld [vmem:[%s3597_s11 + $0x139] sm:$0xff]  ;;  %v482_v34 = vadd.f32 %v4021_v61, %v3844_v54 }
 0x11a   : > { %v4184_v43 = vadd.f32 %v1230_v5, %v1034_v20  ;;  %5070 = vst [vmem:[#allocation44_spill] sm:$0xff] %v4186_v37 }
 0x11b   : > { %2964 = vmatmul.msk.f32.gmra.mxu1 %vm259_vm1, %v4169_v33  ;;  %3126 = vmatmul.msk.f32.gmra.mxu0 %vm259_vm1, %v4189_v10 }
 0x11c   : > { %2997 = vmatmul.msk.f32.gmra.mxu2 %vm259_vm1, %v4182_v36 }
 0x11d   : > { %3063 = vmatmul.msk.f32.gmra.mxu3 %vm259_vm1, %v3641_v12  ;;  %v1646_v12 = vld [vmem:[%s4993_s1 + $0x14] sm:$0xf] }
 0x11e   : > { %3167 = vmatpush.msk.msra.mxu1 %vm356_vm0, %v1646_v12 }
 0x11f   : > { %v955_v39 = vpop.f32.mrf.mxu2 }
 0x120   : > { %v1035_v5 = vadd.f32 %v955_v39, %v758_v30  ;;  %v681_v4 = vpop.f32.mrf.mxu1  ;;  %v1236_v20 = vpop.f32.mrf.mxu3 }
 0x121   : > { %v4214_v8 = vpop.f32.mrf.mxu0 }
 0x122   : > { %v4212_v37 = vadd.f32 %v1233_v14, %v1035_v5  ;;  %5072 = vst [vmem:[#allocation46_spill] sm:$0xff] %v4214_v8  ;;  %v759_v14 = vadd.f32 %v681_v4, %v482_v34  ;;  %v2478_v5 = vld [vmem:[%s4993_s1 + $0x20] sm:$0xf] }
 0x123   : > { %2965 = vmatmul.msk.f32.gmra.mxu1 %vm259_vm1, %v4189_v10  ;;  %3127 = vmatmul.msk.f32.gmra.mxu0 %vm259_vm1, %v4217_v18  ;;  %v4245_v34 = vld [vmem:[%s3597_s11 + $0x141] sm:$0xff] }
 0x124   : > { %5071 = vst [vmem:[#allocation45_spill] sm:$0xff] %v4212_v37  ;;  %2998 = vmatmul.msk.f32.gmra.mxu2 %vm259_vm1, %v4209_v41  ;;  %3362 = vmatpush.msk.msra.mxu0 %vm356_vm0, %v2478_v5  ;;  %v4258_v5 = vld [vmem:[%s3597_s11 + $0x142] sm:$0xff]  ;;  %v4265_v37 = vld [vmem:[%s3597_s11 + $0x151] sm:$0xff] }
 0x125   : > { %3064 = vmatmul.msk.f32.gmra.mxu3 %vm259_vm1, %v3658_v16  ;;  %v483_v16 = vadd.f32 %v4021_v61, %v3864_v59 }
 0x127   : > { %v958_v30 = vpop.f32.mrf.mxu2 }
 0x128   : > { %v1036_v39 = vadd.f32 %v958_v30, %v759_v14  ;;  %v684_v54 = vpop.f32.mrf.mxu1  ;;  %v1239_v12 = vpop.f32.mrf.mxu3 }
 0x129   : > { %v4242_v4 = vpop.f32.mrf.mxu0  ;;  %v760_v14 = vadd.f32 %v684_v54, %v483_v16  ;;  %v484_v54 = vadd.f32 %v4021_v61, %v3886_v1 }
 0x12a   : > { %v4240_v8 = vadd.f32 %v1236_v20, %v1036_v39  ;;  %5074 = vst [vmem:[#allocation48_spill] sm:$0xff] %v4242_v4 }
 0x12b   : > { %2966 = vmatmul.msk.f32.gmra.mxu1 %vm259_vm1, %v4217_v18  ;;  %3128 = vmatmul.msk.f32.gmra.mxu0 %vm259_vm1, %v4245_v34 }
 0x12c   : > { %5073 = vst [vmem:[#allocation47_spill] sm:$0xff] %v4240_v8  ;;  %2999 = vmatmul.msk.f32.gmra.mxu2 %vm259_vm1, %v4237_v25 }
 0x12d   : > { %3065 = vmatmul.msk.f32.gmra.mxu3 %vm259_vm1, %v3685_v22 }
 0x12f   : > { %v961_v20 = vpop.f32.mrf.mxu2 }
 0x130   : > { %v1037_v30 = vadd.f32 %v961_v20, %v760_v14  ;;  %v687_v39 = vpop.f32.mrf.mxu1  ;;  %v1242_v59 = vpop.f32.mrf.mxu3  ;;  %v4278_v20 = vld [vmem:[%s3597_s11 + $0x152] sm:$0xff] }
 0x131   : > { %v4262_v8 = vpop.f32.mrf.mxu0  ;;  %v761_v22 = vadd.f32 %v687_v39, %v484_v54  ;;  %5077 = vst [vmem:[#allocation51_spill] sm:$0xff] %v4278_v20  ;;  %v485_v39 = vadd.f32 %v4021_v61, %v3908_v13 }
 0x132   : > { %v4260_v4 = vadd.f32 %v1239_v12, %v1037_v30  ;;  %5076 = vst [vmem:[#allocation50_spill] sm:$0xff] %v4262_v8 }
 0x133   : > { %2967 = vmatmul.msk.f32.gmra.mxu1 %vm259_vm1, %v4245_v34  ;;  %3129 = vmatmul.msk.f32.gmra.mxu0 %vm259_vm1, %v4265_v37 }
 0x134   : > { %5075 = vst [vmem:[#allocation49_spill] sm:$0xff] %v4260_v4  ;;  %3000 = vmatmul.msk.f32.gmra.mxu2 %vm259_vm1, %v4258_v5  ;;  %v4285_v4 = vld [vmem:[%s3597_s11 + $0x159] sm:$0xff] }
 0x135   : > { %3066 = vmatmul.msk.f32.gmra.mxu3 %vm259_vm1, %v3709_v27 }
 0x137   : > { %v964_v12 = vpop.f32.mrf.mxu2 }
 0x138   : > { %v1038_v16 = vadd.f32 %v964_v12, %v761_v22  ;;  %v690_v14 = vpop.f32.mrf.mxu1  ;;  %v1245_v1 = vpop.f32.mrf.mxu3  ;;  %v4298_v12 = vld [vmem:[%s3597_s11 + $0x15a] sm:$0xff] }
 0x139   : > { %v4282_v8 = vpop.f32.mrf.mxu0  ;;  %v762_v27 = vadd.f32 %v690_v14, %v485_v39  ;;  %5080 = vst [vmem:[#allocation54_spill] sm:$0xff] %v4298_v12 }
 0x13a   : > { %v4280_v30 = vadd.f32 %v1242_v59, %v1038_v16  ;;  %5079 = vst [vmem:[#allocation53_spill] sm:$0xff] %v4282_v8 }
 0x13b   : > { %2968 = vmatmul.msk.f32.gmra.mxu1 %vm259_vm1, %v4265_v37  ;;  %3130 = vmatmul.msk.f32.gmra.mxu0 %vm259_vm1, %v4285_v4 }
 0x13c   : > { %5078 = vst [vmem:[#allocation52_spill] sm:$0xff] %v4280_v30  ;;  %3001 = vmatmul.msk.f32.gmra.mxu2 %vm259_vm1, %v4278_v20  ;;  %v4305_v30 = vld [vmem:[%s3597_s11 + $0x169] sm:$0xff]  ;;  %v4308_v20 = vld [vmem:[%s3597_s11 + $0x180] sm:$0xff] }
 0x13d   : > { %3067 = vmatmul.msk.f32.gmra.mxu3 %vm259_vm1, %v3731_v32  ;;  %5083 = vst [vmem:[#allocation57_spill] sm:$0xff] %v4308_v20  ;;  %v486_v32 = vadd.f32 %v4021_v61, %v3930_v28 }
 0x13f   : > { %v967_v59 = vpop.f32.mrf.mxu2 }
 0x140   : > { %v1039_v54 = vadd.f32 %v967_v59, %v762_v27  ;;  %v693_v22 = vpop.f32.mrf.mxu1  ;;  %v1248_v13 = vpop.f32.mrf.mxu3  ;;  %v4321_v59 = vld [vmem:[%s3597_s11 + $0x16a] sm:$0xff] }
 0x141   : > { %v4302_v8 = vpop.f32.mrf.mxu0  ;;  %v763_v14 = vadd.f32 %v693_v22, %v486_v32  ;;  %5084 = vst [vmem:[#allocation58_spill] sm:$0xff] %v4321_v59  ;;  %v487_v22 = vadd.f32 %v4021_v61, %v3952_v38 }
 0x142   : > { %v4300_v16 = vadd.f32 %v1245_v1, %v1039_v54  ;;  %5082 = vst [vmem:[#allocation56_spill] sm:$0xff] %v4302_v8 }
 0x143   : > { %2969 = vmatmul.msk.f32.gmra.mxu1 %vm259_vm1, %v4285_v4  ;;  %3131 = vmatmul.msk.f32.gmra.mxu0 %vm259_vm1, %v4305_v30 }
 0x144   : > { %5081 = vst [vmem:[#allocation55_spill] sm:$0xff] %v4300_v16  ;;  %3002 = vmatmul.msk.f32.gmra.mxu2 %vm259_vm1, %v4298_v12  ;;  %v4328_v16 = vld [vmem:[%s3597_s11 + $0x171] sm:$0xff]  ;;  %v4331_v12 = vld [vmem:[%s3597_s11 + $0x188] sm:$0xff] }
 0x145   : > { %3068 = vmatmul.msk.f32.gmra.mxu3 %vm259_vm1, %v4308_v20  ;;  %v4351_v20 = vld [vmem:[%s3597_s11 + $0x181] sm:$0xff] }
 0x147   : > { %v970_v1 = vpop.f32.mrf.mxu2 }
 0x148   : > { %v1040_v39 = vadd.f32 %v970_v1, %v763_v14  ;;  %v696_v27 = vpop.f32.mrf.mxu1  ;;  %v1251_v28 = vpop.f32.mrf.mxu3 }
 0x149   : > { %v4325_v8 = vpop.f32.mrf.mxu0 }
 0x14a   : > { %v4323_v54 = vadd.f32 %v1248_v13, %v1040_v39  ;;  %5086 = vst [vmem:[#allocation60_spill] sm:$0xff] %v4325_v8  ;;  %v764_v13 = vadd.f32 %v696_v27, %v487_v22  ;;  %v4344_v39 = vld [vmem:[%s3597_s11 + $0x172] sm:$0xff] }
 0x14b   : > { %2970 = vmatmul.msk.f32.gmra.mxu1 %vm259_vm1, %v4305_v30  ;;  %3132 = vmatmul.msk.f32.gmra.mxu0 %vm259_vm1, %v4328_v16 }
 0x14c   : > { %5085 = vst [vmem:[#allocation59_spill] sm:$0xff] %v4323_v54  ;;  %3003 = vmatmul.msk.f32.gmra.mxu2 %vm259_vm1, %v4321_v59  ;;  %v488_v59 = vadd.f32 %v4021_v61, %v3974_v40 }
 0x14d   : > { %3069 = vmatmul.msk.f32.gmra.mxu3 %vm259_vm1, %v4331_v12 }
 0x14f   : > { %v973_v32 = vpop.f32.mrf.mxu2 }
 0x150   : > { %v1041_v14 = vadd.f32 %v973_v32, %v764_v13  ;;  %v699_v1 = vpop.f32.mrf.mxu1  ;;  %v1254_v8 = vpop.f32.mrf.mxu3 }
 0x151   : > { %v4348_v54 = vpop.f32.mrf.mxu0  ;;  %v765_v27 = vadd.f32 %v699_v1, %v488_v59 }
 0x152   : > { %v4346_v38 = vadd.f32 %v1251_v28, %v1041_v14  ;;  %5088 = vst [vmem:[#allocation62_spill] sm:$0xff] %v4348_v54  ;;  %v4368_v54 = vld [vmem:[%s3597_s11 + $0x189] sm:$0xff] }
 0x153   : > { %2971 = vmatmul.msk.f32.gmra.mxu1 %vm259_vm1, %v4328_v16  ;;  %3133 = vmatmul.msk.f32.gmra.mxu0 %vm259_vm1, %v4351_v20 }
 0x154   : > { %5087 = vst [vmem:[#allocation61_spill] sm:$0xff] %v4346_v38  ;;  %3004 = vmatmul.msk.f32.gmra.mxu2 %vm259_vm1, %v4344_v39  ;;  %v489_v38 = vadd.f32 %v4021_v61, %v3996_v17 }
 0x155   : > { %3298 = vmatmul.msk.f32.vlgmr.msra.gmra.mxu3 %vm259_vm1, %v3782_v45 }
 0x157   : > { %v976_v28 = vpop.f32.mrf.mxu2 }
 0x158   : > { %v1042_v22 = vadd.f32 %v976_v28, %v765_v27  ;;  %v702_v13 = vpop.f32.mrf.mxu1  ;;  %v1257_v32 = vpop.f32.mrf.mxu3 }
 0x159   : > { %v4365_v40 = vpop.f32.mrf.mxu0  ;;  %v766_v45 = vadd.f32 %v702_v13, %v489_v38  ;;  %v3202_v13 = vld [vmem:[%s3597_s11 + $0x48] sm:$0xff] }
 0x15a   : > { %v4363_v14 = vadd.f32 %v1254_v8, %v1042_v22 }
 0x15b   : > { %3168 = vmatmul.msk.f32.vlgmr.msra.gmra.mxu1 %vm259_vm1, %v3769_v42  ;;  %3134 = vmatmul.msk.f32.gmra.mxu0 %vm259_vm1, %v4368_v54  ;;  %v490_v42 = vadd.f32 %v4021_v61, %v3862_v58 }
 0x15c   : > { %3233 = vmatmul.msk.f32.vlgmr.msra.gmra.mxu2 %vm259_vm1, %v3682_v21 }
 0x15d   : > { %3299 = vmatmul.msk.f32.gmra.mxu3 %vm259_vm1, %v3794_v47 }
 0x15f   : > { %v979_v8 = vpop.f32.mrf.mxu2 }
 0x160   : > { %v1043_v59 = vadd.f32 %v979_v8, %v766_v45  ;;  %v705_v1 = vpop.f32.mrf.mxu1  ;;  %v1260_v27 = vpop.f32.mrf.mxu3 }
 0x161   : > { %v4382_v17 = vpop.f32.mrf.mxu0  ;;  %v767_v21 = vadd.f32 %v705_v1, %v490_v42  ;;  %v3203_v1 = vld [vmem:[%s3597_s11 + $0x50] sm:$0xff] }
 0x162   : > { %v4380_v28 = vadd.f32 %v1257_v32, %v1043_v59 }
 0x163   : > { %3169 = vmatmul.msk.f32.gmra.mxu1 %vm259_vm1, %v3779_v44  ;;  %3363 = vmatmul.msk.f32.vlgmr.msra.gmra.mxu0 %vm259_vm1, %v3791_v46 }
 0x164   : > { %3234 = vmatmul.msk.f32.gmra.mxu2 %vm259_vm1, %v3706_v26  ;;  %v491_v26 = vadd.f32 %v4021_v61, %v3884_v0 }
 0x165   : > { %3300 = vmatmul.msk.f32.gmra.mxu3 %vm259_vm1, %v3807_v49 }
 0x167   : > { %v982_v47 = vpop.f32.mrf.mxu2 }
 0x168   : > { %v1044_v38 = vadd.f32 %v982_v47, %v767_v21  ;;  %v708_v22 = vpop.f32.mrf.mxu1  ;;  %v1263_v32 = vpop.f32.mrf.mxu3 }
 0x169   : > { %v4397_v45 = vpop.f32.mrf.mxu0  ;;  %v768_v44 = vadd.f32 %v708_v22, %v491_v26  ;;  %v3204_v22 = vld [vmem:[%s3597_s11 + $0x60] sm:$0xff] }
 0x16a   : > { %v4395_v58 = vadd.f32 %v1260_v27, %v1044_v38 }
 0x16b   : > { %3170 = vmatmul.msk.f32.gmra.mxu1 %vm259_vm1, %v3791_v46  ;;  %3364 = vmatmul.msk.f32.gmra.mxu0 %vm259_vm1, %v3804_v48  ;;  %v492_v46 = vadd.f32 %v4021_v61, %v3906_v11 }
 0x16c   : > { %3235 = vmatmul.msk.f32.gmra.mxu2 %vm259_vm1, %v3202_v13 }
 0x16d   : > { %3301 = vmatmul.msk.f32.gmra.mxu3 %vm259_vm1, %v3820_v51 }
 0x16f   : > { %v985_v49 = vpop.f32.mrf.mxu2 }
 0x170   : > { %v1045_v8 = vadd.f32 %v985_v49, %v768_v44  ;;  %v711_v59 = vpop.f32.mrf.mxu1  ;;  %v1266_v27 = vpop.f32.mrf.mxu3 }
 0x171   : > { %v4411_v0 = vpop.f32.mrf.mxu0  ;;  %v769_v51 = vadd.f32 %v711_v59, %v492_v46 }
 0x172   : > { %v4409_v42 = vadd.f32 %v1263_v32, %v1045_v8  ;;  %v3205_v8 = vld [vmem:[%s3597_s11 + $0x68] sm:$0xff] }
 0x173   : > { %3171 = vmatmul.msk.f32.gmra.mxu1 %vm259_vm1, %v3804_v48  ;;  %3365 = vmatmul.msk.f32.gmra.mxu0 %vm259_vm1, %v3817_v50  ;;  %v493_v48 = vadd.f32 %v4021_v61, %v3928_v19 }
 0x174   : > { %3236 = vmatmul.msk.f32.gmra.mxu2 %vm259_vm1, %v3203_v1 }
 0x175   : > { %3302 = vmatmul.msk.f32.gmra.mxu3 %vm259_vm1, %v3834_v53 }
 0x177   : > { %v988_v21 = vpop.f32.mrf.mxu2 }
 0x178   : > { %v1046_v47 = vadd.f32 %v988_v21, %v769_v51  ;;  %v714_v38 = vpop.f32.mrf.mxu1  ;;  %v1269_v13 = vpop.f32.mrf.mxu3  ;;  %v3206_v21 = vld [vmem:[%s3597_s11 + $0x78] sm:$0xff] }
 0x179   : > { %v4425_v11 = vpop.f32.mrf.mxu0  ;;  %v770_v53 = vadd.f32 %v714_v38, %v493_v48  ;;  %v5095_v48 = vld [vmem:[#allocation9_spill] sm:$0xff] }
 0x17a   : > { %v4423_v32 = vadd.f32 %v1266_v27, %v1046_v47 }
 0x17b   : > { %3172 = vmatmul.msk.f32.gmra.mxu1 %vm259_vm1, %v3817_v50  ;;  %3366 = vmatmul.msk.f32.gmra.mxu0 %vm259_vm1, %v3831_v52  ;;  %v494_v50 = vadd.f32 %v4021_v61, %v3950_v24 }
 0x17c   : > { %3237 = vmatmul.msk.f32.gmra.mxu2 %vm259_vm1, %v3204_v22 }
 0x17d   : > { %3303 = vmatmul.msk.f32.gmra.mxu3 %vm259_vm1, %v3852_v57 }
 0x17f   : > { %v991_v26 = vpop.f32.mrf.mxu2 }
 0x180   : > { %v1047_v44 = vadd.f32 %v991_v26, %v770_v53  ;;  %v717_v49 = vpop.f32.mrf.mxu1  ;;  %v1272_v59 = vpop.f32.mrf.mxu3 }
 0x181   : > { %v4439_v19 = vpop.f32.mrf.mxu0  ;;  %v771_v57 = vadd.f32 %v717_v49, %v494_v50  ;;  %v3207_v49 = vld [vmem:[%s3597_s11 + $0x80] sm:$0xff] }
 0x182   : > { %v4437_v1 = vadd.f32 %v1269_v13, %v1047_v44  ;;  %5090 = vst [vmem:[#allocation64_spill] sm:$0xff] %v4439_v19  ;;  %v5094_v13 = vld [vmem:[#allocation5_spill] sm:$0xff] }
 0x183   : > { %3173 = vmatmul.msk.f32.gmra.mxu1 %vm259_vm1, %v3831_v52  ;;  %3367 = vmatmul.msk.f32.gmra.mxu0 %vm259_vm1, %v3847_v55  ;;  %v5093_v52 = vld [vmem:[#allocation19_spill] sm:$0xff] }
 0x184   : > { %5089 = vst [vmem:[#allocation63_spill] sm:$0xff] %v4437_v1  ;;  %3238 = vmatmul.msk.f32.gmra.mxu2 %vm259_vm1, %v3205_v8  ;;  %v495_v22 = vadd.f32 %v4021_v61, %v5093_v52  ;;  %v3360_v1 = vld [vmem:[%s3597_s11 + $0x19a] sm:$0xff] }
 0x185   : > { %3304 = vmatmul.msk.f32.gmra.mxu3 %vm259_vm1, %v3874_v63 }
 0x187   : > { %v994_v27 = vpop.f32.mrf.mxu2 }
 0x188   : > { %v1048_v46 = vadd.f32 %v994_v27, %v771_v57  ;;  %v720_v51 = vpop.f32.mrf.mxu1  ;;  %v1275_v47 = vpop.f32.mrf.mxu3  ;;  %v5099_v27 = vld [vmem:[#allocation7_spill] sm:$0xff] }
 0x189   : > { %v4453_v24 = vpop.f32.mrf.mxu0  ;;  %v772_v63 = vadd.f32 %v720_v51, %v495_v22  ;;  %v5100_v51 = vld [vmem:[#allocation12_spill] sm:$0xff]  ;;  %v3208_v22 = vld [vmem:[%s3597_s11 + $0x90] sm:$0xff] }
 0x18a   : > { %v4451_v38 = vadd.f32 %v1272_v59, %v1048_v46  ;;  %5092 = vst [vmem:[#allocation66_spill] sm:$0xff] %v4453_v24  ;;  %v5168_v24 = vld [vmem:[#allocation59_spill] sm:$0xff] }
 0x18b   : > { %3174 = vmatmul.msk.f32.gmra.mxu1 %vm259_vm1, %v3847_v55  ;;  %3368 = vmatmul.msk.f32.gmra.mxu0 %vm259_vm1, %v5094_v13  ;;  %v5098_v55 = vld [vmem:[#allocation23_spill] sm:$0xff] }
 0x18c   : > { %5091 = vst [vmem:[#allocation65_spill] sm:$0xff] %v4451_v38  ;;  %3239 = vmatmul.msk.f32.gmra.mxu2 %vm259_vm1, %v3206_v21  ;;  %v496_v57 = vadd.f32 %v4021_v61, %v5098_v55  ;;  %v5105_v55 = vld [vmem:[#allocation15_spill] sm:$0xff]  ;;  %v5169_v38 = vld [vmem:[#allocation60_spill] sm:$0xff] }
 0x18d   : > { %3305 = vmatmul.msk.f32.gmra.mxu3 %vm259_vm1, %v5095_v48 }
 0x18f   : > { %v997_v53 = vpop.f32.mrf.mxu2 }
 0x190   : > { %v1049_v26 = vadd.f32 %v997_v53, %v772_v63  ;;  %v723_v44 = vpop.f32.mrf.mxu1  ;;  %v1278_v8 = vpop.f32.mrf.mxu3 }
 0x191   : > { %v4467_v50 = vpop.f32.mrf.mxu0  ;;  %v773_v46 = vadd.f32 %v723_v44, %v496_v57  ;;  %v5104_v44 = vld [vmem:[#allocation10_spill] sm:$0xff] }
 0x192   : > { %v4465_v59 = vadd.f32 %v1275_v47, %v1049_v26  ;;  %5097 = vst [vmem:[#allocation5_spill] sm:$0xff] %v4467_v50  ;;  %v3231_v50 = vld [vmem:[%s3597_s11 + $0x1a0] sm:$0xff] }
 0x193   : > { %3175 = vmatmul.msk.f32.gmra.mxu1 %vm259_vm1, %v5094_v13  ;;  %3369 = vmatmul.msk.f32.gmra.mxu0 %vm259_vm1, %v5099_v27  ;;  %v5103_v13 = vld [vmem:[#allocation27_spill] sm:$0xff] }
 0x194   : > { %5096 = vst [vmem:[#allocation19_spill] sm:$0xff] %v4465_v59  ;;  %3240 = vmatmul.msk.f32.gmra.mxu2 %vm259_vm1, %v3207_v49  ;;  %v497_v26 = vadd.f32 %v4021_v61, %v5103_v13 }
 0x195   : > { %3306 = vmatmul.msk.f32.gmra.mxu3 %vm259_vm1, %v5100_v51  ;;  %v3209_v51 = vld [vmem:[%s3597_s11 + $0x98] sm:$0xff] }
 0x197   : > { %v1000_v21 = vpop.f32.mrf.mxu2 }
 0x198   : > { %v1050_v47 = vadd.f32 %v1000_v21, %v773_v46  ;;  %v726_v52 = vpop.f32.mrf.mxu1  ;;  %v1281_v63 = vpop.f32.mrf.mxu3 }
 0x199   : > { %v4481_v53 = vpop.f32.mrf.mxu0  ;;  %v774_v49 = vadd.f32 %v726_v52, %v497_v26  ;;  %v5109_v52 = vld [vmem:[#allocation13_spill] sm:$0xff] }
 0x19a   : > { %v4479_v48 = vadd.f32 %v1278_v8, %v1050_v47  ;;  %5102 = vst [vmem:[#allocation23_spill] sm:$0xff] %v4481_v53  ;;  %v5167_v53 = vld [vmem:[#allocation62_spill] sm:$0xff] }
 0x19b   : > { %3176 = vmatmul.msk.f32.gmra.mxu1 %vm259_vm1, %v5099_v27  ;;  %3370 = vmatmul.msk.f32.gmra.mxu0 %vm259_vm1, %v5104_v44  ;;  %v5108_v27 = vld [vmem:[#allocation6_spill] sm:$0xff] }
 0x19c   : > { %5101 = vst [vmem:[#allocation9_spill] sm:$0xff] %v4479_v48  ;;  %3241 = vmatmul.msk.f32.gmra.mxu2 %vm259_vm1, %v3208_v22  ;;  %v498_v22 = vadd.f32 %v4021_v61, %v5108_v27 }
 0x19d   : > { %3307 = vmatmul.msk.f32.gmra.mxu3 %vm259_vm1, %v5105_v55 }
 0x19f   : > { %v1003_v57 = vpop.f32.mrf.mxu2 }
 0x1a0   : > { %v1051_v8 = vadd.f32 %v1003_v57, %v774_v49  ;;  %v729_v46 = vpop.f32.mrf.mxu1  ;;  %v1284_v21 = vpop.f32.mrf.mxu3  ;;  %v5110_v49 = vld [vmem:[#allocation18_spill] sm:$0xff] }
 0x1a1   : > { %v4495_v13 = vpop.f32.mrf.mxu0  ;;  %v775_v26 = vadd.f32 %v729_v46, %v498_v22  ;;  %v5114_v46 = vld [vmem:[#allocation16_spill] sm:$0xff] }
 0x1a2   : > { %v4493_v47 = vadd.f32 %v1281_v63, %v1051_v8  ;;  %5107 = vst [vmem:[#allocation12_spill] sm:$0xff] %v4495_v13  ;;  %v3210_v8 = vld [vmem:[%s3597_s11 + $0xa8] sm:$0xff] }
 0x1a3   : > { %3177 = vmatmul.msk.f32.gmra.mxu1 %vm259_vm1, %v5104_v44  ;;  %3371 = vmatmul.msk.f32.gmra.mxu0 %vm259_vm1, %v5109_v52  ;;  %v5113_v44 = vld [vmem:[#allocation8_spill] sm:$0xff] }
 0x1a4   : > { %5106 = vst [vmem:[#allocation7_spill] sm:$0xff] %v4493_v47  ;;  %3242 = vmatmul.msk.f32.gmra.mxu2 %vm259_vm1, %v3209_v51  ;;  %v499_v51 = vadd.f32 %v4021_v61, %v5113_v44 }
 0x1a5   : > { %3308 = vmatmul.msk.f32.gmra.mxu3 %vm259_vm1, %v5110_v49 }
 0x1a7   : > { %v1006_v55 = vpop.f32.mrf.mxu2 }
 0x1a8   : > { %v1052_v63 = vadd.f32 %v1006_v55, %v775_v26  ;;  %v732_v57 = vpop.f32.mrf.mxu1  ;;  %v1287_v13 = vpop.f32.mrf.mxu3  ;;  %v5115_v26 = vld [vmem:[#allocation22_spill] sm:$0xff] }
 0x1a9   : > { %v4509_v27 = vpop.f32.mrf.mxu0  ;;  %v776_v22 = vadd.f32 %v732_v57, %v499_v51  ;;  %v5119_v57 = vld [vmem:[#allocation20_spill] sm:$0xff] }
 0x1aa   : > { %v4507_v47 = vadd.f32 %v1284_v21, %v1052_v63  ;;  %5112 = vst [vmem:[#allocation10_spill] sm:$0xff] %v4509_v27  ;;  %v3211_v63 = vld [vmem:[%s3597_s11 + $0xb0] sm:$0xff] }
 0x1ab   : > { %3178 = vmatmul.msk.f32.gmra.mxu1 %vm259_vm1, %v5109_v52  ;;  %3372 = vmatmul.msk.f32.gmra.mxu0 %vm259_vm1, %v5114_v46  ;;  %v5118_v52 = vld [vmem:[#allocation11_spill] sm:$0xff] }
 0x1ac   : > { %5111 = vst [vmem:[#allocation27_spill] sm:$0xff] %v4507_v47  ;;  %3243 = vmatmul.msk.f32.gmra.mxu2 %vm259_vm1, %v3210_v8  ;;  %v500_v8 = vadd.f32 %v4021_v61, %v5118_v52 }
 0x1ad   : > { %3309 = vmatmul.msk.f32.gmra.mxu3 %vm259_vm1, %v5115_v26 }
 0x1af   : > { %v1009_v49 = vpop.f32.mrf.mxu2 }
 0x1b0   : > { %v1053_v21 = vadd.f32 %v1009_v49, %v776_v22  ;;  %v735_v55 = vpop.f32.mrf.mxu1  ;;  %v1290_v27 = vpop.f32.mrf.mxu3  ;;  %v5120_v22 = vld [vmem:[#allocation26_spill] sm:$0xff] }
 0x1b1   : > { %v4523_v44 = vpop.f32.mrf.mxu0  ;;  %v777_v51 = vadd.f32 %v735_v55, %v500_v8  ;;  %v5124_v55 = vld [vmem:[#allocation24_spill] sm:$0xff] }
 0x1b2   : > { %v4521_v47 = vadd.f32 %v1287_v13, %v1053_v21  ;;  %5117 = vst [vmem:[#allocation6_spill] sm:$0xff] %v4523_v44  ;;  %v3212_v21 = vld [vmem:[%s3597_s11 + $0xc0] sm:$0xff] }
 0x1b3   : > { %3179 = vmatmul.msk.f32.gmra.mxu1 %vm259_vm1, %v5114_v46  ;;  %3373 = vmatmul.msk.f32.gmra.mxu0 %vm259_vm1, %v5119_v57  ;;  %v5123_v46 = vld [vmem:[#allocation14_spill] sm:$0xff] }
 0x1b4   : > { %5116 = vst [vmem:[#allocation15_spill] sm:$0xff] %v4521_v47  ;;  %3244 = vmatmul.msk.f32.gmra.mxu2 %vm259_vm1, %v3211_v63  ;;  %v501_v63 = vadd.f32 %v4021_v61, %v5123_v46 }
 0x1b5   : > { %3310 = vmatmul.msk.f32.gmra.mxu3 %vm259_vm1, %v5120_v22 }
 0x1b7   : > { %v1012_v26 = vpop.f32.mrf.mxu2 }
 0x1b8   : > { %v1054_v13 = vadd.f32 %v1012_v26, %v777_v51  ;;  %v738_v49 = vpop.f32.mrf.mxu1  ;;  %v1293_v44 = vpop.f32.mrf.mxu3  ;;  %v3213_v26 = vld [vmem:[%s3597_s11 + $0xc8] sm:$0xff] }
 0x1b9   : > { %v4537_v52 = vpop.f32.mrf.mxu0  ;;  %v778_v8 = vadd.f32 %v738_v49, %v501_v63  ;;  %v5128_v49 = vld [vmem:[#allocation28_spill] sm:$0xff] }
 0x1ba   : > { %v4535_v47 = vadd.f32 %v1290_v27, %v1054_v13  ;;  %5122 = vst [vmem:[#allocation18_spill] sm:$0xff] %v4537_v52 }
 0x1bb   : > { %3180 = vmatmul.msk.f32.gmra.mxu1 %vm259_vm1, %v5119_v57  ;;  %3374 = vmatmul.msk.f32.gmra.mxu0 %vm259_vm1, %v5124_v55  ;;  %v5127_v57 = vld [vmem:[#allocation17_spill] sm:$0xff] }
 0x1bc   : > { %5121 = vst [vmem:[#allocation13_spill] sm:$0xff] %v4535_v47  ;;  %3245 = vmatmul.msk.f32.gmra.mxu2 %vm259_vm1, %v3212_v21  ;;  %v502_v21 = vadd.f32 %v4021_v61, %v5127_v57 }
 0x1bd   : > { %3311 = vmatmul.msk.f32.gmra.mxu3 %vm259_vm1, %v4029_v23 }
 0x1bf   : > { %v1015_v51 = vpop.f32.mrf.mxu2 }
 0x1c0   : > { %v1055_v27 = vadd.f32 %v1015_v51, %v778_v8  ;;  %v741_v22 = vpop.f32.mrf.mxu1  ;;  %v1296_v13 = vpop.f32.mrf.mxu3  ;;  %v3214_v51 = vld [vmem:[%s3597_s11 + $0xd8] sm:$0xff] }
 0x1c1   : > { %v4551_v46 = vpop.f32.mrf.mxu0  ;;  %v779_v23 = vadd.f32 %v741_v22, %v502_v21 }
 0x1c2   : > { %v4549_v52 = vadd.f32 %v1293_v44, %v1055_v27  ;;  %5126 = vst [vmem:[#allocation16_spill] sm:$0xff] %v4551_v46  ;;  %v3358_v46 = vld [vmem:[%s3597_s11 + $0x182] sm:$0xff] }
 0x1c3   : > { %3181 = vmatmul.msk.f32.gmra.mxu1 %vm259_vm1, %v5124_v55  ;;  %3375 = vmatmul.msk.f32.gmra.mxu0 %vm259_vm1, %v5128_v49  ;;  %v5131_v55 = vld [vmem:[#allocation21_spill] sm:$0xff] }
 0x1c4   : > { %5125 = vst [vmem:[#allocation8_spill] sm:$0xff] %v4549_v52  ;;  %3246 = vmatmul.msk.f32.gmra.mxu2 %vm259_vm1, %v3213_v26  ;;  %v503_v26 = vadd.f32 %v4021_v61, %v5131_v55  ;;  %v3295_v52 = vld [vmem:[%s3597_s11 + $0x199] sm:$0xff] }
 0x1c5   : > { %3312 = vmatmul.msk.f32.gmra.mxu3 %vm259_vm1, %v4049_v15 }
 0x1c7   : > { %v1018_v63 = vpop.f32.mrf.mxu2 }
 0x1c8   : > { %v1056_v44 = vadd.f32 %v1018_v63, %v779_v23  ;;  %v744_v8 = vpop.f32.mrf.mxu1  ;;  %v1299_v27 = vpop.f32.mrf.mxu3  ;;  %v3215_v23 = vld [vmem:[%s3597_s11 + $0xe0] sm:$0xff] }
 0x1c9   : > { %v4565_v57 = vpop.f32.mrf.mxu0  ;;  %v780_v15 = vadd.f32 %v744_v8, %v503_v26 }
 0x1ca   : > { %v4563_v47 = vadd.f32 %v1296_v13, %v1056_v44  ;;  %5130 = vst [vmem:[#allocation11_spill] sm:$0xff] %v4565_v57 }
 0x1cb   : > { %3182 = vmatmul.msk.f32.gmra.mxu1 %vm259_vm1, %v5128_v49  ;;  %3376 = vmatmul.msk.f32.gmra.mxu0 %vm259_vm1, %v4042_v60  ;;  %v5134_v49 = vld [vmem:[#allocation25_spill] sm:$0xff] }
 0x1cc   : > { %5129 = vst [vmem:[#allocation22_spill] sm:$0xff] %v4563_v47  ;;  %3247 = vmatmul.msk.f32.gmra.mxu2 %vm259_vm1, %v3214_v51  ;;  %v504_v51 = vadd.f32 %v4021_v61, %v5134_v49  ;;  %v5138_v49 = vld [vmem:[#allocation30_spill] sm:$0xff] }
 0x1cd   : > { %3313 = vmatmul.msk.f32.gmra.mxu3 %vm259_vm1, %v4069_v29 }
 0x1cf   : > { %v1021_v22 = vpop.f32.mrf.mxu2 }
 0x1d0   : > { %v1057_v13 = vadd.f32 %v1021_v22, %v780_v15  ;;  %v747_v21 = vpop.f32.mrf.mxu1  ;;  %v1302_v63 = vpop.f32.mrf.mxu3  ;;  %v3216_v15 = vld [vmem:[%s3597_s11 + $0xf0] sm:$0xff] }
 0x1d1   : > { %v4579_v55 = vpop.f32.mrf.mxu0  ;;  %v781_v29 = vadd.f32 %v747_v21, %v504_v51 }
 0x1d2   : > { %v4577_v44 = vadd.f32 %v1299_v27, %v1057_v13  ;;  %5133 = vst [vmem:[#allocation26_spill] sm:$0xff] %v4579_v55  ;;  %v3359_v55 = vld [vmem:[%s3597_s11 + $0x18a] sm:$0xff] }
 0x1d3   : > { %3183 = vmatmul.msk.f32.gmra.mxu1 %vm259_vm1, %v4042_v60  ;;  %3377 = vmatmul.msk.f32.gmra.mxu0 %vm259_vm1, %v4062_v2  ;;  %v5137_v60 = vld [vmem:[#allocation29_spill] sm:$0xff] }
 0x1d4   : > { %5132 = vst [vmem:[#allocation20_spill] sm:$0xff] %v4577_v44  ;;  %3248 = vmatmul.msk.f32.gmra.mxu2 %vm259_vm1, %v3215_v23  ;;  %v1582_v23 = vadd.f32 %v5138_v49, %v5137_v60  ;;  %v5142_v49 = vld [vmem:[#allocation32_spill] sm:$0xff] }
 0x1d5   : > { %3314 = vmatmul.msk.f32.gmra.mxu3 %vm259_vm1, %v4089_v6  ;;  %v3296_v44 = vld [vmem:[%s3597_s11 + $0x1a1] sm:$0xff] }
 0x1d7   : > { %v1024_v8 = vpop.f32.mrf.mxu2 }
 0x1d8   : > { %v1058_v27 = vadd.f32 %v1024_v8, %v781_v29  ;;  %v1763_v26 = vpop.f32.mrf.mxu1  ;;  %v2318_v22 = vpop.f32.mrf.mxu3  ;;  %v3217_v29 = vld [vmem:[%s3597_s11 + $0xf8] sm:$0xff] }
 0x1d9   : > { %v4593_v61 = vpop.f32.mrf.mxu0  ;;  %v1859_v6 = vadd.f32 %v1763_v26, %v1582_v23 }
 0x1da   : > { %v4591_v13 = vadd.f32 %v1302_v63, %v1058_v27  ;;  %5136 = vst [vmem:[#allocation24_spill] sm:$0xff] %v4593_v61 }
 0x1db   : > { %3184 = vmatmul.msk.f32.gmra.mxu1 %vm259_vm1, %v4062_v2  ;;  %3378 = vmatmul.msk.f32.gmra.mxu0 %vm259_vm1, %v4082_v3  ;;  %v5141_v2 = vld [vmem:[#allocation31_spill] sm:$0xff] }
 0x1dc   : > { %5135 = vst [vmem:[#allocation14_spill] sm:$0xff] %v4591_v13  ;;  %3249 = vmatmul.msk.f32.gmra.mxu2 %vm259_vm1, %v3216_v15  ;;  %v1583_v15 = vadd.f32 %v5142_v49, %v5141_v2  ;;  %v5146_v49 = vld [vmem:[#allocation34_spill] sm:$0xff] }
 0x1dd   : > { %3315 = vmatmul.msk.f32.gmra.mxu3 %vm259_vm1, %v4109_v31 }
 0x1df   : > { %v2041_v21 = vpop.f32.mrf.mxu2 }
 0x1e0   : > { %v2137_v63 = vadd.f32 %v2041_v21, %v1859_v6  ;;  %v1766_v51 = vpop.f32.mrf.mxu1  ;;  %v2321_v8 = vpop.f32.mrf.mxu3  ;;  %v3218_v6 = vld [vmem:[%s3597_s11 + $0x108] sm:$0xff] }
 0x1e1   : > { %v4607_v60 = vpop.f32.mrf.mxu0  ;;  %v1860_v31 = vadd.f32 %v1766_v51, %v1583_v15 }
 0x1e2   : > { %v4605_v27 = vadd.f32 %v2318_v22, %v2137_v63  ;;  %5140 = vst [vmem:[#allocation28_spill] sm:$0xff] %v4607_v60  ;;  %v1595_v60 = vadd.f32 %v5169_v38, %v5168_v24 }
 0x1e3   : > { %3185 = vmatmul.msk.f32.gmra.mxu1 %vm259_vm1, %v4082_v3  ;;  %3379 = vmatmul.msk.f32.gmra.mxu0 %vm259_vm1, %v4102_v56  ;;  %v5145_v3 = vld [vmem:[#allocation33_spill] sm:$0xff] }
 0x1e4   : > { %5139 = vst [vmem:[#allocation17_spill] sm:$0xff] %v4605_v27  ;;  %3250 = vmatmul.msk.f32.gmra.mxu2 %vm259_vm1, %v3217_v29  ;;  %v1584_v29 = vadd.f32 %v5146_v49, %v5145_v3  ;;  %v5150_v49 = vld [vmem:[#allocation36_spill] sm:$0xff] }
 0x1e5   : > { %3316 = vmatmul.msk.f32.gmra.mxu3 %vm259_vm1, %v4129_v35 }
 0x1e7   : > { %v2044_v26 = vpop.f32.mrf.mxu2 }
 0x1e8   : > { %v2138_v22 = vadd.f32 %v2044_v26, %v1860_v31  ;;  %v1769_v23 = vpop.f32.mrf.mxu1  ;;  %v2324_v21 = vpop.f32.mrf.mxu3  ;;  %v3219_v31 = vld [vmem:[%s3597_s11 + $0x110] sm:$0xff] }
 0x1e9   : > { %v4621_v2 = vpop.f32.mrf.mxu0  ;;  %v1861_v35 = vadd.f32 %v1769_v23, %v1584_v29 }
 0x1ea   : > { %v4619_v63 = vadd.f32 %v2321_v8, %v2138_v22  ;;  %5144 = vst [vmem:[#allocation25_spill] sm:$0xff] %v4621_v2  ;;  %v5171_v2 = vld [vmem:[#allocation56_spill] sm:$0xff] }
 0x1eb   : > { %3186 = vmatmul.msk.f32.gmra.mxu1 %vm259_vm1, %v4102_v56  ;;  %3380 = vmatmul.msk.f32.gmra.mxu0 %vm259_vm1, %v4122_v62  ;;  %v5149_v56 = vld [vmem:[#allocation35_spill] sm:$0xff] }
 0x1ec   : > { %5143 = vst [vmem:[#allocation21_spill] sm:$0xff] %v4619_v63  ;;  %3251 = vmatmul.msk.f32.gmra.mxu2 %vm259_vm1, %v3218_v6  ;;  %v1585_v6 = vadd.f32 %v5150_v49, %v5149_v56  ;;  %v5153_v49 = vld [vmem:[#allocation38_spill] sm:$0xff]  ;;  %v1597_v63 = vadd.f32 %v4365_v40, %v4363_v14  ;;  %v1598_v14 = vadd.f32 %v4382_v17, %v4380_v28 }
 0x1ed   : > { %3317 = vmatmul.msk.f32.gmra.mxu3 %vm259_vm1, %v4149_v9 }
 0x1ef   : > { %v2047_v51 = vpop.f32.mrf.mxu2 }
 0x1f0   : > { %v2139_v8 = vadd.f32 %v2047_v51, %v1861_v35  ;;  %v1772_v15 = vpop.f32.mrf.mxu1  ;;  %v2327_v26 = vpop.f32.mrf.mxu3  ;;  %v3220_v35 = vld [vmem:[%s3597_s11 + $0x120] sm:$0xff] }
 0x1f1   : > { %v4635_v3 = vpop.f32.mrf.mxu0  ;;  %v1862_v9 = vadd.f32 %v1772_v15, %v1585_v6  ;;  %v5154_v15 = vld [vmem:[#allocation41_spill] sm:$0xff] }
 0x1f2   : > { %v4633_v22 = vadd.f32 %v2324_v21, %v2139_v8  ;;  %5148 = vst [vmem:[#allocation30_spill] sm:$0xff] %v4635_v3 }
 0x1f3   : > { %3187 = vmatmul.msk.f32.gmra.mxu1 %vm259_vm1, %v4122_v62  ;;  %3381 = vmatmul.msk.f32.gmra.mxu0 %vm259_vm1, %v4142_v7  ;;  %v5152_v62 = vld [vmem:[#allocation37_spill] sm:$0xff] }
 0x1f4   : > { %5147 = vst [vmem:[#allocation29_spill] sm:$0xff] %v4633_v22  ;;  %3252 = vmatmul.msk.f32.gmra.mxu2 %vm259_vm1, %v3219_v31  ;;  %v1586_v31 = vadd.f32 %v5153_v49, %v5152_v62  ;;  %v5156_v49 = vld [vmem:[#allocation40_spill] sm:$0xff]  ;;  %v5174_v22 = vld [vmem:[#allocation49_spill] sm:$0xff] }
 0x1f5   : > { %3318 = vmatmul.msk.f32.gmra.mxu3 %vm259_vm1, %v4169_v33 }
 0x1f7   : > { %v2050_v23 = vpop.f32.mrf.mxu2 }
 0x1f8   : > { %v2140_v21 = vadd.f32 %v2050_v23, %v1862_v9  ;;  %v1775_v29 = vpop.f32.mrf.mxu1  ;;  %v2330_v51 = vpop.f32.mrf.mxu3  ;;  %v3221_v23 = vld [vmem:[%s3597_s11 + $0x128] sm:$0xff] }
 0x1f9   : > { %v4649_v56 = vpop.f32.mrf.mxu0  ;;  %v1863_v33 = vadd.f32 %v1775_v29, %v1586_v31 }
 0x1fa   : > { %v4647_v8 = vadd.f32 %v2327_v26, %v2140_v21  ;;  %5151 = vst [vmem:[#allocation31_spill] sm:$0xff] %v4649_v56  ;;  %v5175_v56 = vld [vmem:[#allocation50_spill] sm:$0xff] }
 0x1fb   : > { %3188 = vmatmul.msk.f32.gmra.mxu1 %vm259_vm1, %v4142_v7  ;;  %3382 = vmatmul.msk.f32.gmra.mxu0 %vm259_vm1, %v5154_v15  ;;  %v5155_v7 = vld [vmem:[#allocation39_spill] sm:$0xff] }
 0x1fc   : > { %3253 = vmatmul.msk.f32.gmra.mxu2 %vm259_vm1, %v3220_v35  ;;  %v1587_v35 = vadd.f32 %v5156_v49, %v5155_v7  ;;  %v5158_v49 = vld [vmem:[#allocation43_spill] sm:$0xff] }
 0x1fd   : > { %3319 = vmatmul.msk.f32.gmra.mxu3 %vm259_vm1, %v4189_v10 }
 0x1ff   : > { %v2053_v6 = vpop.f32.mrf.mxu2 }
 0x200   : > { %v2141_v26 = vadd.f32 %v2053_v6, %v1863_v33  ;;  %v1778_v9 = vpop.f32.mrf.mxu1  ;;  %v2333_v21 = vpop.f32.mrf.mxu3  ;;  %v3222_v33 = vld [vmem:[%s3597_s11 + $0x138] sm:$0xff] }
 0x201   : > { %v4663_v62 = vpop.f32.mrf.mxu0  ;;  %v1864_v10 = vadd.f32 %v1778_v9, %v1587_v35 }
 0x202   : > { %v4661_v61 = vadd.f32 %v2330_v51, %v2141_v26 }
 0x203   : > { %3189 = vmatmul.msk.f32.gmra.mxu1 %vm259_vm1, %v5154_v15  ;;  %3383 = vmatmul.msk.f32.gmra.mxu0 %vm259_vm1, %v4182_v36  ;;  %v5157_v15 = vld [vmem:[#allocation42_spill] sm:$0xff] }
 0x204   : > { %3254 = vmatmul.msk.f32.gmra.mxu2 %vm259_vm1, %v3221_v23  ;;  %v1588_v23 = vadd.f32 %v5158_v49, %v5157_v15 }
 0x205   : > { %3320 = vmatmul.msk.f32.gmra.mxu3 %vm259_vm1, %v4217_v18 }
 0x207   : > { %v2056_v29 = vpop.f32.mrf.mxu2 }
 0x208   : > { %v2142_v51 = vadd.f32 %v2056_v29, %v1864_v10  ;;  %v1781_v31 = vpop.f32.mrf.mxu1  ;;  %v2336_v6 = vpop.f32.mrf.mxu3  ;;  %v3223_v10 = vld [vmem:[%s3597_s11 + $0x140] sm:$0xff] }
 0x209   : > { %v4677_v7 = vpop.f32.mrf.mxu0  ;;  %v1865_v18 = vadd.f32 %v1781_v31, %v1588_v23  ;;  %v3224_v23 = vld [vmem:[%s3597_s11 + $0x150] sm:$0xff] }
 0x20a   : > { %v4675_v26 = vadd.f32 %v2333_v21, %v2142_v51 }
 0x20b   : > { %3190 = vmatmul.msk.f32.gmra.mxu1 %vm259_vm1, %v4182_v36  ;;  %3384 = vmatmul.msk.f32.gmra.mxu0 %vm259_vm1, %v4209_v41  ;;  %v5159_v36 = vld [vmem:[#allocation44_spill] sm:$0xff] }
 0x20c   : > { %3255 = vmatmul.msk.f32.gmra.mxu2 %vm259_vm1, %v3222_v33  ;;  %v1589_v33 = vadd.f32 %v5159_v36, %v4184_v43 }
 0x20d   : > { %3321 = vmatmul.msk.f32.gmra.mxu3 %vm259_vm1, %v4245_v34 }
 0x20f   : > { %v2059_v9 = vpop.f32.mrf.mxu2 }
 0x210   : > { %v2143_v21 = vadd.f32 %v2059_v9, %v1865_v18  ;;  %v1784_v35 = vpop.f32.mrf.mxu1  ;;  %v2339_v29 = vpop.f32.mrf.mxu3 }
 0x211   : > { %v4691_v15 = vpop.f32.mrf.mxu0  ;;  %v1866_v34 = vadd.f32 %v1784_v35, %v1589_v33  ;;  %v3225_v33 = vld [vmem:[%s3597_s11 + $0x158] sm:$0xff] }
 0x212   : > { %v4689_v51 = vadd.f32 %v2336_v6, %v2143_v21  ;;  %v5161_v21 = vld [vmem:[#allocation46_spill] sm:$0xff] }
 0x213   : > { %3191 = vmatmul.msk.f32.gmra.mxu1 %vm259_vm1, %v4209_v41  ;;  %3385 = vmatmul.msk.f32.gmra.mxu0 %vm259_vm1, %v4237_v25  ;;  %v5160_v41 = vld [vmem:[#allocation45_spill] sm:$0xff] }
 0x214   : > { %3256 = vmatmul.msk.f32.gmra.mxu2 %vm259_vm1, %v3223_v10  ;;  %v1590_v10 = vadd.f32 %v5161_v21, %v5160_v41 }
 0x215   : > { %3322 = vmatmul.msk.f32.gmra.mxu3 %vm259_vm1, %v4265_v37 }
 0x217   : > { %v2062_v31 = vpop.f32.mrf.mxu2 }
 0x218   : > { %v2144_v6 = vadd.f32 %v2062_v31, %v1866_v34  ;;  %v1787_v49 = vpop.f32.mrf.mxu1  ;;  %v2342_v18 = vpop.f32.mrf.mxu3 }
 0x219   : > { %v4705_v43 = vpop.f32.mrf.mxu0  ;;  %v1867_v37 = vadd.f32 %v1787_v49, %v1590_v10  ;;  %v5162_v49 = vld [vmem:[#allocation51_spill] sm:$0xff] }
 0x21a   : > { %v4703_v9 = vadd.f32 %v2339_v29, %v2144_v6 }
 0x21b   : > { %3192 = vmatmul.msk.f32.gmra.mxu1 %vm259_vm1, %v4237_v25  ;;  %3386 = vmatmul.msk.f32.gmra.mxu0 %vm259_vm1, %v4258_v5 }
 0x21c   : > { %3257 = vmatmul.msk.f32.gmra.mxu2 %vm259_vm1, %v3224_v23 }
 0x21d   : > { %3323 = vmatmul.msk.f32.gmra.mxu3 %vm259_vm1, %v4285_v4 }
 0x21f   : > { %v2065_v35 = vpop.f32.mrf.mxu2 }
 0x220   : > { %v2145_v29 = vadd.f32 %v2065_v35, %v1867_v37  ;;  %v4716_v36 = vpop.f32.mrf.mxu1  ;;  %v4719_v34 = vpop.f32.mrf.mxu3  ;;  %v3227_v37 = vld [vmem:[%s3597_s11 + $0x170] sm:$0xff] }
 0x221   : > { %v2619_v6 = vpop.f32.mrf.mxu0 }
 0x222   : > { %v2422_v31 = vadd.f32 %v2342_v18, %v2145_v29  ;;  %v3226_v18 = vld [vmem:[%s3597_s11 + $0x168] sm:$0xff] }
 0x223   : > { %3193 = vmatmul.msk.f32.gmra.mxu1 %vm259_vm1, %v4258_v5  ;;  %3387 = vmatmul.msk.f32.gmra.mxu0 %vm259_vm1, %v5162_v49  ;;  %v5163_v5 = vld [vmem:[#allocation54_spill] sm:$0xff] }
 0x224   : > { %v4721_v25 = vadd.f32 %v2619_v6, %v2422_v31  ;;  %3258 = vmatmul.msk.f32.gmra.mxu2 %vm259_vm1, %v3225_v33  ;;  %v5164_v33 = vld [vmem:[#allocation58_spill] sm:$0xff] }
 0x225   : > { %3324 = vmatmul.msk.f32.gmra.mxu3 %vm259_vm1, %v4305_v30 }
 0x227   : > { %v4730_v4 = vpop.f32.mrf.mxu2 }
 0x228   : > { %v4732_v23 = vpop.f32.mrf.mxu1  ;;  %v4735_v41 = vpop.f32.mrf.mxu3 }
 0x229   : > { %v4737_v21 = vpop.f32.mrf.mxu0 }
 0x22b   : > { %3194 = vmatmul.msk.f32.gmra.mxu1 %vm259_vm1, %v5162_v49  ;;  %3388 = vmatmul.msk.f32.gmra.mxu0 %vm259_vm1, %v5163_v5 }
 0x22c   : > { %3259 = vmatmul.msk.f32.gmra.mxu2 %vm259_vm1, %v3226_v18  ;;  %v5165_v18 = vld [vmem:[#allocation57_spill] sm:$0xff] }
 0x22d   : > { %3325 = vmatmul.msk.f32.gmra.mxu3 %vm259_vm1, %v4328_v16 }
 0x22f   : > { %v4746_v30 = vpop.f32.mrf.mxu2 }
 0x230   : > { %v1796_v10 = vpop.f32.mrf.mxu1  ;;  %v4749_v35 = vpop.f32.mrf.mxu3 }
 0x231   : > { %v4751_v29 = vpop.f32.mrf.mxu0 }
 0x233   : > { %3195 = vmatmul.msk.f32.gmra.mxu1 %vm259_vm1, %v5163_v5  ;;  %3389 = vmatmul.msk.f32.gmra.mxu0 %vm259_vm1, %v5164_v33 }
 0x234   : > { %3260 = vmatmul.msk.f32.gmra.mxu2 %vm259_vm1, %v3227_v37 }
 0x235   : > { %3326 = vmatmul.msk.f32.gmra.mxu3 %vm259_vm1, %v4351_v20 }
 0x237   : > { %v2074_v16 = vpop.f32.mrf.mxu2 }
 0x238   : > { %v1799_v31 = vpop.f32.mrf.mxu1  ;;  %v4760_v6 = vpop.f32.mrf.mxu3 }
 0x239   : > { %v4762_v49 = vpop.f32.mrf.mxu0 }
 0x23b   : > { %3196 = vmatmul.msk.f32.gmra.mxu1 %vm259_vm1, %v5164_v33  ;;  %3390 = vmatmul.msk.f32.gmra.mxu0 %vm259_vm1, %v4344_v39 }
 0x23c   : > { %3261 = vmatmul.msk.f32.gmra.mxu2 %vm259_vm1, %v5165_v18  ;;  %v3230_v18 = vld [vmem:[%s3597_s11 + $0x198] sm:$0xff] }
 0x23d   : > { %3327 = vmatmul.msk.f32.gmra.mxu3 %vm259_vm1, %v4368_v54 }
 0x23f   : > { %v2077_v20 = vpop.f32.mrf.mxu2 }
 0x240   : > { %v1802_v5 = vpop.f32.mrf.mxu1  ;;  %v2357_v37 = vpop.f32.mrf.mxu3 }
 0x241   : > { %v4772_v13 = vpop.f32.mrf.mxu0 }
 0x243   : > { %3197 = vmatmul.msk.f32.gmra.mxu1 %vm259_vm1, %v4344_v39  ;;  %3391 = vmatmul.msk.f32.gmra.mxu0 %vm259_vm1, %v3358_v46  ;;  %v5166_v39 = vld [vmem:[#allocation61_spill] sm:$0xff] }
 0x244   : > { %3262 = vmatmul.msk.f32.gmra.mxu2 %vm259_vm1, %v4331_v12 }
 0x245   : > { %3328 = vmatmul.msk.f32.gmra.mxu3 %vm259_vm1, %v3295_v52  ;;  %v1596_v52 = vadd.f32 %v5167_v53, %v5166_v39  ;;  %v5172_v53 = vld [vmem:[#allocation52_spill] sm:$0xff]  ;;  %v5173_v39 = vld [vmem:[#allocation53_spill] sm:$0xff] }
 0x246   : > { %v1593_v38 = vadd.f32 %v5173_v39, %v5172_v53 }
 0x247   : > { %v2080_v54 = vpop.f32.mrf.mxu2 }
 0x248   : > { %v1805_v33 = vpop.f32.mrf.mxu1  ;;  %v2360_v57 = vpop.f32.mrf.mxu3 }
 0x249   : > { %v2634_v47 = vpop.f32.mrf.mxu0  ;;  %v1873_v27 = vadd.f32 %v1805_v33, %v1596_v52 }
 0x24b   : > { %3198 = vmatmul.msk.f32.gmra.mxu1 %vm259_vm1, %v3358_v46  ;;  %3392 = vmatmul.msk.f32.gmra.mxu0 %vm259_vm1, %v3359_v55  ;;  %v5170_v46 = vld [vmem:[#allocation55_spill] sm:$0xff] }
 0x24c   : > { %3263 = vmatmul.msk.f32.gmra.mxu2 %vm259_vm1, %v3230_v18  ;;  %v1594_v18 = vadd.f32 %v5171_v2, %v5170_v46  ;;  %v1592_v2 = vadd.f32 %v5175_v56, %v5174_v22 }
 0x24d   : > { %3329 = vmatmul.msk.f32.gmra.mxu3 %vm259_vm1, %v3296_v44  ;;  %v1872_v44 = vadd.f32 %v1802_v5, %v1595_v60  ;;  %v5176_v5 = vld [vmem:[#allocation47_spill] sm:$0xff] }
 0x24e   : > { %v1871_v24 = vadd.f32 %v1799_v31, %v1594_v18  ;;  %v1869_v46 = vadd.f32 %v4732_v23, %v1592_v2 }
 0x24f   : > { %v2083_v12 = vpop.f32.mrf.mxu2  ;;  %v2150_v33 = vadd.f32 %v2080_v54, %v1872_v44  ;;  %v3361_v44 = vld [vmem:[%s3597_s11 + $0x1a2] sm:$0xff]  ;;  %s215_s11 = sand.u32 1, %s3496_s19  }
 0x250   : > { %v1808_v48 = vpop.f32.mrf.mxu1  ;;  %v2363_v59 = vpop.f32.mrf.mxu3  ;;  %v2151_v3 = vadd.f32 %v2083_v12, %v1873_v27  ;;  %v1870_v27 = vadd.f32 %v1796_v10, %v1593_v38  ;;  %v2147_v17 = vadd.f32 %v4746_v30, %v1869_v46  ;;  %s216_s26 = scalar_lea.vmem [#allocation2], %s215_s11  ;;  %s2834_s7 = scalar_lea.sflag [#allocation3], %s215_s11 }
 0x251   : > { %v2637_v19 = vpop.f32.mrf.mxu0  ;;  %v1874_v52 = vadd.f32 %v1808_v48, %v1597_v63  ;;  %v2427_v63 = vadd.f32 %v2357_v37, %v2150_v33  ;;  %s2844_s30 = sshll.u32 %s216_s26, 4  ;;  %s2845_s30 = int_to_ptr.vmem [resolvable:$true] %s2844_s30 }
 0x252   : > { %v2428_v60 = vadd.f32 %v2360_v57, %v2151_v3  ;;  %v2148_v48 = vadd.f32 %v2074_v16, %v1870_v27 }
 0x253   : > { %3199 = vmatmul.msk.f32.gmra.mxu1 %vm259_vm1, %v3359_v55  ;;  %3393 = vmatmul.msk.f32.gmra.mxu0 %vm259_vm1, %v3360_v1  ;;  %v2149_v55 = vadd.f32 %v2077_v20, %v1871_v24  ;;  %v5177_v1 = vld [vmem:[#allocation48_spill] sm:$0xff]  ;;  %v2704_v16 = vadd.f32 %v2634_v47, %v2427_v63 }
 0x254   : > { %3264 = vmatmul.msk.f32.gmra.mxu2 %vm259_vm1, %v3231_v50  ;;  %v1591_v12 = vadd.f32 %v5177_v1, %v5176_v5  ;;  %v2705_v3 = vadd.f32 %v2637_v19, %v2428_v60  ;;  %v2425_v23 = vadd.f32 %v4749_v35, %v2148_v48 }
 0x255   : > { %v2426_v57 = vadd.f32 %v4760_v6, %v2149_v55  ;;  %v2736_v35 = vmax.f32 %v2704_v16, 0.0  ;;  %v5186_v16 = vld [vmem:[#allocation28_spill] sm:$0xff] }
 0x256   : > { %v1868_v28 = vadd.f32 %v4716_v36, %v1591_v12  ;;  %v2424_v36 = vadd.f32 %v4735_v41, %v2147_v17  ;;  %v2737_v39 = vmax.f32 %v2705_v3, 0.0  ;;  %v2702_v24 = vadd.f32 %v4762_v49, %v2425_v23  ;;  %v5185_v23 = vld [vmem:[#allocation17_spill] sm:$0xff] }
 0x257   : > { %v2086_v40 = vpop.f32.mrf.mxu2  ;;  %v2703_v30 = vadd.f32 %v4772_v13, %v2426_v57  ;;  %v2731_v12 = vmax.f32 %v4721_v25, 0.0  ;;  %v5178_v25 = vld [vmem:[#allocation31_spill] sm:$0xff] }
 0x258   : > { %v2152_v50 = vadd.f32 %v2086_v40, %v1874_v52  ;;  %v1811_v31 = vpop.f32.mrf.mxu1  ;;  %v2366_v54 = vpop.f32.mrf.mxu3  ;;  %v2146_v20 = vadd.f32 %v4730_v4, %v1868_v28  ;;  %v2734_v2 = vmax.f32 %v2702_v24, 0.0  ;;  %v2694_v63 = vadd.f32 %v5178_v25, %v4647_v8  ;;  %v5184_v8 = vld [vmem:[#allocation64_spill] sm:$0xff] }
 0x259   : > { %v1875_v18 = vadd.f32 %v1811_v31, %v1598_v14  ;;  %v2640_v56 = vpop.f32.mrf.mxu0  ;;  %v1600_v14 = vadd.f32 %v4411_v0, %v4409_v42  ;;  %v2696_v42 = vadd.f32 %v4677_v7, %v4675_v26 }
 0x25a   : > { %v2429_v22 = vadd.f32 %v2363_v59, %v2152_v50  ;;  %v1599_v59 = vadd.f32 %v4397_v45, %v4395_v58  ;;  %v2423_v19 = vadd.f32 %v4719_v34, %v2146_v20  ;;  %v2701_v58 = vadd.f32 %v4751_v29, %v2424_v36 }
 0x25b   : > { %3394 = vmatmul.msk.f32.gmra.mxu0 %vm259_vm1, %v3361_v44  ;;  %v2735_v45 = vmax.f32 %v2703_v30, 0.0  ;;  %v2698_v29 = vadd.f32 %v4705_v43, %v4703_v9  ;;  %v1601_v9 = vadd.f32 %v4425_v11, %v4423_v32  ;;  %v2695_v43 = vadd.f32 %v4663_v62, %v4661_v61  ;;  %v5180_v44 = vld [vmem:[#allocation30_spill] sm:$0xff]  ;;  %v5181_v61 = vld [vmem:[#allocation21_spill] sm:$0xff] }
 0x25c   : > { %v2706_v10 = vadd.f32 %v2640_v56, %v2429_v22  ;;  %v2700_v13 = vadd.f32 %v4737_v21, %v2423_v19  ;;  %v2733_v49 = vmax.f32 %v2701_v58, 0.0  ;;  %v2697_v21 = vadd.f32 %v4691_v15, %v4689_v51  ;;  %v5179_v56 = vld [vmem:[#allocation29_spill] sm:$0xff] }
 0x25d   : > { %v2730_v0 = vmax.f32 %v2698_v29, 0.0  ;;  %v2693_v28 = vadd.f32 %v5180_v44, %v5179_v56  ;;  %v2727_v32 = vmax.f32 %v2695_v43, 0.0  ;;  %v5182_v62 = vld [vmem:[#allocation25_spill] sm:$0xff]  ;;  %v2726_v57 = vmax.f32 %v2694_v63, 0.0 }
 0x25e   : > { %v2738_v37 = vmax.f32 %v2706_v10, 0.0  ;;  %v2732_v60 = vmax.f32 %v2700_v13, 0.0  ;;  %v2692_v17 = vadd.f32 %v5182_v62, %v5181_v61  ;;  %v5183_v10 = vld [vmem:[#allocation63_spill] sm:$0xff] }
 0x25f   : > { %v2089_v53 = vpop.f32.mrf.mxu2  ;;  %v1602_v20 = vadd.f32 %v5184_v8, %v5183_v10 }
 0x260   : > { %v2153_v6 = vadd.f32 %v2089_v53, %v1875_v18  ;;  %2755 = vmatpush.msrb.mxu1 %v2738_v37  ;;  %v1814_v4 = vpop.f32.mrf.mxu1  ;;  %v2369_v38 = vpop.f32.mrf.mxu3  ;;  %v2728_v18 = vmax.f32 %v2696_v42, 0.0  ;;  %v2691_v37 = vadd.f32 %v5186_v16, %v5185_v23 }
 0x261   : > { %v1876_v47 = vadd.f32 %v1814_v4, %v1599_v59  ;;  %v2643_v52 = vpop.f32.mrf.mxu0  ;;  %v2725_v59 = vmax.f32 %v2693_v28, 0.0 }
 0x262   : > { %v2430_v33 = vadd.f32 %v2366_v54, %v2153_v6  ;;  %2756 = vmatpush.msrb.mxu1 %v2737_v39  ;;  %v2729_v54 = vmax.f32 %v2697_v21, 0.0  ;;  %v2724_v39 = vmax.f32 %v2692_v17, 0.0 }
 0x264   : > { %v4825_v41 = vadd.f32 %v2643_v52, %v2430_v33  ;;  %2757 = vmatpush.msrb.mxu1 %v2736_v35  ;;  %v5188_v33 = vld [vmem:[#allocation66_spill] sm:$0xff] }
 0x266   : > { %2758 = vmatpush.msrb.mxu1 %v2735_v45 }
 0x267   : > { %v2092_v34 = vpop.f32.mrf.mxu2 }
 0x268   : > { %v2154_v40 = vadd.f32 %v2092_v34, %v1876_v47  ;;  %2759 = vmatpush.msrb.mxu1 %v2734_v2  ;;  %v1817_v27 = vpop.f32.mrf.mxu1  ;;  %v2372_v55 = vpop.f32.mrf.mxu3  ;;  %v5187_v47 = vld [vmem:[#allocation65_spill] sm:$0xff] }
 0x269   : > { %v1877_v50 = vadd.f32 %v1817_v27, %v1600_v14  ;;  %v2646_v1 = vpop.f32.mrf.mxu0  ;;  %v1603_v52 = vadd.f32 %v5188_v33, %v5187_v47  ;;  %v5189_v27 = vld [vmem:[#allocation19_spill] sm:$0xff] }
 0x26a   : > { %v2431_v5 = vadd.f32 %v2369_v38, %v2154_v40  ;;  %2760 = vmatpush.msrb.mxu1 %v2733_v49  ;;  %v2723_v38 = vmax.f32 %v2691_v37, 0.0 }
 0x26c   : > { %v4835_v46 = vadd.f32 %v2646_v1, %v2431_v5  ;;  %2761 = vmatpush.msrb.mxu1 %v2732_v60 }
 0x26e   : > { %2762 = vmatpush.msrb.mxu1 %v2731_v12 }
 0x26f   : > { %v2095_v31 = vpop.f32.mrf.mxu2 }
 0x270   : > { %v2155_v48 = vadd.f32 %v2095_v31, %v1877_v50  ;;  %2763 = vmatpush.msrb.mxu1 %v2730_v0  ;;  %v1820_v51 = vpop.f32.mrf.mxu1  ;;  %v2375_v15 = vpop.f32.mrf.mxu3  ;;  %v5191_v31 = vld [vmem:[#allocation9_spill] sm:$0xff] }
 0x271   : > { %v1878_v22 = vadd.f32 %v1820_v51, %v1601_v9  ;;  %v2649_v7 = vpop.f32.mrf.mxu0  ;;  %v5192_v9 = vld [vmem:[#allocation23_spill] sm:$0xff] }
 0x272   : > { %v2432_v26 = vadd.f32 %v2372_v55, %v2155_v48  ;;  %2764 = vmatpush.msrb.mxu1 %v2729_v54  ;;  %v5190_v55 = vld [vmem:[#allocation5_spill] sm:$0xff]  ;;  %v1605_v43 = vadd.f32 %v5192_v9, %v5191_v31  ;;  %v5199_v31 = vld [vmem:[#allocation8_spill] sm:$0xff] }
 0x273   : > { %v1604_v29 = vadd.f32 %v5190_v55, %v5189_v27  ;;  %v5195_v55 = vld [vmem:[#allocation20_spill] sm:$0xff] }
 0x274   : > { %v4847_v11 = vadd.f32 %v2649_v7, %v2432_v26  ;;  %2765 = vmatpush.msrb.mxu1 %v2728_v18  ;;  %v5193_v26 = vld [vmem:[#allocation7_spill] sm:$0xff]  ;;  %v5194_v7 = vld [vmem:[#allocation12_spill] sm:$0xff] }
 0x275   : > { %v1606_v56 = vadd.f32 %v5194_v7, %v5193_v26  ;;  %v5200_v9 = vld [vmem:[#allocation16_spill] sm:$0xff] }
 0x276   : > { %2766 = vmatpush.msrb.mxu1 %v2727_v32 }
 0x277   : > { %v2098_v3 = vpop.f32.mrf.mxu2 }
 0x278   : > { %v2156_v53 = vadd.f32 %v2098_v3, %v1878_v22  ;;  %2767 = vmatpush.msrb.mxu1 %v2726_v57  ;;  %v1823_v36 = vpop.f32.mrf.mxu1  ;;  %v2378_v30 = vpop.f32.mrf.mxu3 }
 0x279   : > { %v1879_v6 = vadd.f32 %v1823_v36, %v1602_v20  ;;  %v2652_v4 = vpop.f32.mrf.mxu0 }
 0x27a   : > { %v2433_v19 = vadd.f32 %v2375_v15, %v2156_v53  ;;  %2768 = vmatpush.msrb.mxu1 %v2725_v59 }
 0x27c   : > { %v4855_v24 = vadd.f32 %v2652_v4, %v2433_v19  ;;  %2769 = vmatpush.msrb.mxu1 %v2724_v39 }
 0x27e   : > { %2770 = vmatpush.msrb.mxu1 %v2723_v38 }
 0x27f   : > { %v2101_v35 = vpop.f32.mrf.mxu2 }
 0x280   : > { %v2157_v58 = vadd.f32 %v2101_v35, %v1879_v6  ;;  %v1826_v45 = vpop.f32.mrf.mxu1  ;;  %v2381_v13 = vpop.f32.mrf.mxu3 }
 0x281   : > { %v1880_v2 = vadd.f32 %v1826_v45, %v1603_v52  ;;  %v2655_v14 = vpop.f32.mrf.mxu0 }
 0x282   : > { %v2434_v34 = vadd.f32 %v2378_v30, %v2157_v58 }
 0x284   : > { %v4859_v49 = vadd.f32 %v2655_v14, %v2434_v34 }
 0x287   : > { %v2104_v40 = vpop.f32.mrf.mxu2 }
 0x288   : > { %v2158_v60 = vadd.f32 %v2104_v40, %v1880_v2  ;;  %v1829_v50 = vpop.f32.mrf.mxu1  ;;  %v2384_v5 = vpop.f32.mrf.mxu3 }
 0x289   : > { %v1881_v1 = vadd.f32 %v1829_v50, %v1604_v29  ;;  %v2658_v12 = vpop.f32.mrf.mxu0  ;;  %v5196_v29 = vld [vmem:[#allocation26_spill] sm:$0xff] }
 0x28a   : > { %v2435_v21 = vadd.f32 %v2381_v13, %v2158_v60  ;;  %v1612_v60 = vadd.f32 %v5196_v29, %v5195_v55  ;;  %v5197_v50 = vld [vmem:[#allocation22_spill] sm:$0xff] }
 0x28b   : > { %v5208_v55 = vld [vmem:[#allocation10_spill] sm:$0xff] }
 0x28c   : > { %v4863_v42 = vadd.f32 %v2658_v12, %v2435_v21 }
 0x28f   : > { %v2107_v0 = vpop.f32.mrf.mxu2 }
 0x290   : > { %v2159_v54 = vadd.f32 %v2107_v0, %v1881_v1  ;;  %v1832_v48 = vpop.f32.mrf.mxu1  ;;  %v2387_v51 = vpop.f32.mrf.mxu3 }
 0x291   : > { %v1882_v15 = vadd.f32 %v1832_v48, %v1605_v43  ;;  %v2661_v63 = vpop.f32.mrf.mxu0  ;;  %v1610_v43 = vadd.f32 %v5200_v9, %v5199_v31  ;;  %v5202_v48 = vld [vmem:[#allocation24_spill] sm:$0xff] }
 0x292   : > { %v2436_v25 = vadd.f32 %v2384_v5, %v2159_v54  ;;  %v5198_v5 = vld [vmem:[#allocation11_spill] sm:$0xff]  ;;  %v5201_v54 = vld [vmem:[#allocation14_spill] sm:$0xff] }
 0x293   : > { %v1611_v1 = vadd.f32 %v5198_v5, %v5197_v50 }
 0x294   : > { %v4867_v18 = vadd.f32 %v2661_v63, %v2436_v25  ;;  %v5203_v63 = vld [vmem:[#allocation13_spill] sm:$0xff] }
 0x297   : > { %v2110_v22 = vpop.f32.mrf.mxu2 }
 0x298   : > { %v2160_v44 = vadd.f32 %v2110_v22, %v1882_v15  ;;  %v1835_v28 = vpop.f32.mrf.mxu1  ;;  %v2390_v32 = vpop.f32.mrf.mxu3  ;;  %v5204_v22 = vld [vmem:[#allocation18_spill] sm:$0xff] }
 0x299   : > { %v1883_v61 = vadd.f32 %v1835_v28, %v1606_v56  ;;  %v2664_v17 = vpop.f32.mrf.mxu0  ;;  %v1609_v26 = vadd.f32 %v5204_v22, %v5203_v63  ;;  %v5205_v28 = vld [vmem:[#allocation15_spill] sm:$0xff] }
 0x29a   : > { %v2437_v62 = vadd.f32 %v2387_v51, %v2160_v44  ;;  %v1613_v51 = vadd.f32 %v5202_v48, %v5201_v54  ;;  %v2801_v22 = vld [vmem:[%s4995_s3 + $0x30] sm:$0xff] }
 0x29c   : > { %v4871_v57 = vadd.f32 %v2664_v17, %v2437_v62 }
 0x29e   : > { %v2746_v63 = vmax.f32 %v4871_v57, 0.0  ;;  %v2799_v57 = vld [vmem:[%s4995_s3 + $0x20] sm:$0xff] }
 0x29f   : > { %v2113_v3 = vpop.f32.mrf.mxu2 }
 0x2a0   : > { %v2161_v10 = vadd.f32 %v2113_v3, %v1883_v61  ;;  %v1838_v8 = vpop.f32.mrf.mxu1  ;;  %v4873_v20 = vpop.f32.mrf.mxu3 }
 0x2a1   : > { %v2667_v16 = vpop.f32.mrf.mxu0 }
 0x2a2   : > { %v2438_v23 = vadd.f32 %v2390_v32, %v2161_v10  ;;  %v5206_v32 = vld [vmem:[#allocation6_spill] sm:$0xff] }
 0x2a3   : > { %v1608_v61 = vadd.f32 %v5206_v32, %v5205_v28  ;;  %v2741_v28 = vmax.f32 %v4847_v11, 0.0  ;;  %v2740_v32 = vmax.f32 %v4835_v46, 0.0  ;;  %v2811_v46 = vld [vmem:[%s4996_s4] sm:$0x1] }
 0x2a4   : > { %v4875_v37 = vadd.f32 %v2667_v16, %v2438_v23 }
 0x2a7   : > { %v2116_v59 = vpop.f32.mrf.mxu2 }
 0x2a8   : > { %v1841_v53 = vpop.f32.mrf.mxu1  ;;  %v2396_v36 = vpop.f32.mrf.mxu3 }
 0x2a9   : > { %v4877_v30 = vpop.f32.mrf.mxu0 }
 0x2af   : > { %v2119_v39 = vpop.f32.mrf.mxu2 }
 0x2b0   : > { %v1844_v6 = vpop.f32.mrf.mxu1  ;;  %v2399_v19 = vpop.f32.mrf.mxu3 }
 0x2b1   : > { %v4879_v4 = vpop.f32.mrf.mxu0  ;;  %v1886_v3 = vadd.f32 %v1844_v6, %v1609_v26  ;;  %v2745_v26 = vmax.f32 %v4867_v18, 0.0  ;;  %v2798_v18 = vld [vmem:[%s4995_s3 + $0x18] sm:$0xff] }
 0x2b7   : > { %v2122_v38 = vpop.f32.mrf.mxu2 }
 0x2b8   : > { %v1847_v35 = vpop.f32.mrf.mxu1  ;;  %v2402_v47 = vpop.f32.mrf.mxu3 }
 0x2b9   : > { %v2676_v33 = vpop.f32.mrf.mxu0  ;;  %v1887_v7 = vadd.f32 %v1847_v35, %v1610_v43 }
 0x2bf   : > { %v2125_v52 = vpop.f32.mrf.mxu2 }
 0x2c0   : > { %v1850_v58 = vpop.f32.mrf.mxu1  ;;  %v2405_v13 = vpop.f32.mrf.mxu3  ;;  %v2165_v10 = vadd.f32 %v2125_v52, %v1887_v7  ;;  %v2810_v52 = vld [vmem:[%s4995_s3 + $0x78] sm:$0xff]  ;;  %v2744_v7 = vmax.f32 %v4863_v42, 0.0  ;;  %v2797_v42 = vld [vmem:[%s4995_s3 + $0x10] sm:$0xff] }
 0x2c1   : > { %v2679_v45 = vpop.f32.mrf.mxu0  ;;  %v1888_v15 = vadd.f32 %v1850_v58, %v1611_v1  ;;  %v1885_v58 = vadd.f32 %v1841_v53, %v1608_v61  ;;  %v2809_v53 = vld [vmem:[%s4995_s3 + $0x70] sm:$0xff]  ;;  %2812 = vmatpush.msrb.mxu3 %v2810_v52  ;;  %v2739_v61 = vmax.f32 %v4825_v41, 0.0 }
 0x2c2   : > { %v2442_v1 = vadd.f32 %v2402_v47, %v2165_v10 }
 0x2c3   : > { %2813 = vmatpush.msrb.mxu3 %v2809_v53 }
 0x2c7   : > { %v2128_v2 = vpop.f32.mrf.mxu2 }
 0x2c8   : > { %v1853_v34 = vpop.f32.mrf.mxu1  ;;  %v2408_v40 = vpop.f32.mrf.mxu3  ;;  %v2166_v56 = vadd.f32 %v2128_v2, %v1888_v15  ;;  %v2163_v2 = vadd.f32 %v2119_v39, %v1885_v58  ;;  %v2719_v39 = vadd.f32 %v2679_v45, %v2442_v1  ;;  %v2747_v15 = vmax.f32 %v4875_v37, 0.0  ;;  %v2800_v37 = vld [vmem:[%s4995_s3 + $0x28] sm:$0xff] }
 0x2c9   : > { %v2682_v14 = vpop.f32.mrf.mxu0  ;;  %v1889_v21 = vadd.f32 %v1853_v34, %v1612_v60  ;;  %v5207_v34 = vld [vmem:[#allocation27_spill] sm:$0xff] }
 0x2ca   : > { %v1607_v29 = vadd.f32 %v5208_v55, %v5207_v34  ;;  %v2443_v60 = vadd.f32 %v2405_v13, %v2166_v56  ;;  %v2751_v45 = vmax.f32 %v2719_v39, 0.0  ;;  %v2743_v56 = vmax.f32 %v4859_v49, 0.0  ;;  %v2796_v49 = vld [vmem:[%s4995_s3 + $0x8] sm:$0xff] }
 0x2cc   : > { %v1884_v35 = vadd.f32 %v1838_v8, %v1607_v29  ;;  %v2720_v43 = vadd.f32 %v2682_v14, %v2443_v60  ;;  %v2440_v8 = vadd.f32 %v2396_v36, %v2163_v2 }
 0x2ce   : > { %v2162_v31 = vadd.f32 %v2116_v59, %v1884_v35  ;;  %v2808_v59 = vld [vmem:[%s4995_s3 + $0x68] sm:$0xff]  ;;  %v2752_v14 = vmax.f32 %v2720_v43, 0.0  ;;  %v2717_v36 = vadd.f32 %v4879_v4, %v2440_v8 }
 0x2cf   : > { %v2131_v27 = vpop.f32.mrf.mxu2  ;;  %2814 = vmatpush.msrb.mxu3 %v2808_v59  ;;  %v2804_v4 = vld [vmem:[%s4995_s3 + $0x48] sm:$0xff] }
 0x2d0   : > { %v1856_v0 = vpop.f32.mrf.mxu1  ;;  %v2167_v25 = vadd.f32 %v2131_v27, %v1889_v21  ;;  %v2411_v17 = vpop.f32.mrf.mxu3  ;;  %v2164_v27 = vadd.f32 %v2122_v38, %v1886_v3  ;;  %v3506_v38 = vmov 1.0   ;;  %v2749_v48 = vmax.f32 %v2717_v36, 0.0 }
 0x2d1   : > { %v2685_v12 = vpop.f32.mrf.mxu0  ;;  %v1890_v44 = vadd.f32 %v1856_v0, %v1613_v51  ;;  %2771 = vmatmul.f32.vlgmr.msrb.gmra.mxu1 %v3506_v38 }
 0x2d2   : > { %v2444_v23 = vadd.f32 %v2408_v40, %v2167_v25  ;;  %v2441_v9 = vadd.f32 %v2399_v19, %v2164_v27  ;;  %v2439_v19 = vadd.f32 %v4873_v20, %v2162_v31  ;;  %v2807_v40 = vld [vmem:[%s4995_s3 + $0x60] sm:$0xff]  ;;  %v2802_v25 = vld [vmem:[%s4995_s3 + $0x38] sm:$0xff] }
 0x2d3   : > { %2815 = vmatpush.msrb.mxu3 %v2807_v40 }
 0x2d4   : > { %v2721_v21 = vadd.f32 %v2685_v12, %v2444_v23  ;;  %v2718_v13 = vadd.f32 %v2676_v33, %v2441_v9  ;;  %v2806_v12 = vld [vmem:[%s4995_s3 + $0x58] sm:$0xff]  ;;  %v2716_v54 = vadd.f32 %v4877_v30, %v2439_v19  ;;  %v2805_v33 = vld [vmem:[%s4995_s3 + $0x50] sm:$0xff]  ;;  %v2803_v30 = vld [vmem:[%s4995_s3 + $0x40] sm:$0xff] }
 0x2d5   : > { %2816 = vmatpush.msrb.mxu3 %v2806_v12 }
 0x2d6   : > { %v2753_v47 = vmax.f32 %v2721_v21, 0.0  ;;  %v2750_v20 = vmax.f32 %v2718_v13, 0.0  ;;  %v2748_v51 = vmax.f32 %v2716_v54, 0.0 }
 0x2d7   : > { %v2134_v62 = vpop.f32.mrf.mxu2  ;;  %2817 = vmatpush.msrb.mxu3 %v2805_v33 }
 0x2d8   : > { %v2168_v16 = vadd.f32 %v2134_v62, %v1890_v44  ;;  %v2742_v44 = vmax.f32 %v4855_v24, 0.0  ;;  %v2795_v24 = vld [vmem:[%s4995_s3] sm:$0xff] }
 0x2d9   : > { %v2688_v5 = vpop.f32.mrf.mxu0  ;;  %2818 = vmatpush.msrb.mxu3 %v2804_v4 }
 0x2da   : > { %v2445_v50 = vadd.f32 %v2411_v17, %v2168_v16 }
 0x2db   : > { %2819 = vmatpush.msrb.mxu3 %v2803_v30 }
 0x2dc   : > { %v2722_v0 = vadd.f32 %v2688_v5, %v2445_v50 }
 0x2dd   : > { %2820 = vmatpush.msrb.mxu3 %v2802_v25 }
 0x2de   : > { %v2754_v6 = vmax.f32 %v2722_v0, 0.0 }
 0x2df   : > { %2821 = vmatpush.msrb.mxu3 %v2801_v22 }
 0x2e0   : > { %2775 = vmatpush.msrb.mxu2 %v2754_v6 }
 0x2e1   : > { %2822 = vmatpush.msrb.mxu3 %v2800_v37 }
 0x2e2   : > { %2776 = vmatpush.msrb.mxu2 %v2753_v47 }
 0x2e3   : > { %2823 = vmatpush.msrb.mxu3 %v2799_v57 }
 0x2e4   : > { %2777 = vmatpush.msrb.mxu2 %v2752_v14 }
 0x2e5   : > { %2824 = vmatpush.msrb.mxu3 %v2798_v18 }
 0x2e6   : > { %2778 = vmatpush.msrb.mxu2 %v2751_v45 }
 0x2e7   : > { %2825 = vmatpush.msrb.mxu3 %v2797_v42 }
 0x2e8   : > { %2779 = vmatpush.msrb.mxu2 %v2750_v20 }
 0x2e9   : > { %2826 = vmatpush.msrb.mxu3 %v2796_v49 }
 0x2ea   : > { %2780 = vmatpush.msrb.mxu2 %v2749_v48 }
 0x2eb   : > { %2827 = vmatpush.msrb.mxu3 %v2795_v24 }
 0x2ec   : > { %2781 = vmatpush.msrb.mxu2 %v2748_v51 }
 0x2ee   : > { %2782 = vmatpush.msrb.mxu2 %v2747_v15 }
 0x2f0   : > { %2783 = vmatpush.msrb.mxu2 %v2746_v63 }
 0x2f2   : > { %2784 = vmatpush.msrb.mxu2 %v2745_v26 }
 0x2f4   : > { %2785 = vmatpush.msrb.mxu2 %v2744_v7 }
 0x2f6   : > { %2786 = vmatpush.msrb.mxu2 %v2743_v56 }
 0x2f8   : > { %2787 = vmatpush.msrb.mxu2 %v2742_v44 }
 0x2fa   : > { %2788 = vmatpush.msrb.mxu2 %v2741_v28 }
 0x2fc   : > { %2789 = vmatpush.msrb.mxu2 %v2740_v32 }
 0x2fe   : > { %2790 = vmatpush.msrb.mxu2 %v2739_v61 }
 0x2ff   : > { %2791 = vmatmul.f32.vlgmr.msrb.gmra.mxu2 %v3506_v38 }
 0x34e   : > { %v2772_v11 = vpop.f32.mrf.mxu1 }
 0x382   : > { %v2792_v62 = vpop.f32.mrf.mxu2 }
 0x383   : > { %v2793_v17 = vadd.f32 %v2792_v62, %v2772_v11 }
 0x385   : > { %2828 = vmatmul.f32.vlgmr.msrb.gmra.mxu3 %v2793_v17 }
 0x408   : > { %v2829_v41 = vpop.f32.mrf.mxu3 }
 0x409   : > { %v2830_v3 = vadd.f32 %v2829_v41, %v2811_v46 }
 0x40b   : > { %2832 = vst [vmem:[%s216_s26] sm:$0x1] %v2830_v3 }
 0x40c   : > { %3469 = shalt.err (!%p3466_p3)
}
 0x40d   : > { %3401 = dma.vmem_to_hbm [thread:$0]  (%p3575_p5), %s2845_s30, 16, %s2847_s6, %s2834_s7  }
 0x40e PF: > { %p3407_p4 = scmp.ge.s32.totalorder %s3504_s21, 2  ;;  %s2858_s11 = sand.u32 1, %s3492_s18  }
 0x40f   : > { %s2859_s15 = scalar_lea.sflag [#allocation3], %s2858_s11 }
 0x410   : > { %p3404_p7 = pnand %p3407_p4, %p3579_p6 }
 0x412   : > { %p3405_p8 = pneg %p3404_p7 }
 0x414   : > { %3487 = dma.done.wait (%p3405_p8), %s2859_s15, 16  }
 0x415   : > { %3489 = vsyncadd (%p3405_p8), %s2859_s15, 4294967280  ;;  %p15_p9 = scmp.ge.s32.totalorder %s3562_s24, 4   ;;  %s5209_s18 = smov %s3496_s19 }
 0x416   : > { %s5210_s19 = smov %s3500_s20  ;;  %s5211_s20 = smov %s3573_s27 }
 0x417   : > { %s5212_s21 = smov %s3562_s24  ;;  %17 = sbr.rel (!%p15_p9) target bundleno = 3 (0x3), region = 77 }
 0x41c   :  { %2864 = vsyncpa [#allocation3], 1 }
 0x41d   :  { %2866 = vsyncpa [#allocation3 + $0x1], 1 }

</bundles_post_ra>
